<compile_context>
chip_gen: v7x
topology: tpu7x:2x2x1
jax: 0.10.0
libtpu: 0.0.40
codegen_flags: <defaults>
</compile_context>

<pallas_src>
import jax
import jax.numpy as jnp
from jax.experimental import pallas as pl
from jax.experimental.pallas import tpu as pltpu


# ----------------------------------------------------------------------------
# plain-JAX helpers
# ----------------------------------------------------------------------------

def leaky_relu(x, slope=0.2):
    return jnp.where(x > 0, x, slope * x)


def dense_head(x, w1, b1, w2, b2):
    """Linear -> LeakyReLU(0.2) -> Linear.  Tiny heads: not worth a Pallas kernel."""
    return leaky_relu(x @ w1 + b1) @ w2 + b2


def quaternion_to_rotmat(q):
    # TODO(synk): models.utils.Quaternion is external; standard (x, y, z, w)
    # normalized-quaternion -> rotation-matrix with a 1e-5 eps norm assumed.
    norm = jnp.sqrt(1e-5 + jnp.sum(q * q, axis=-1, keepdims=True))
    q = q / norm
    x, y, z, w = q[..., 0], q[..., 1], q[..., 2], q[..., 3]
    rot = jnp.stack([
        1.0 - 2.0 * (y * y + z * z), 2.0 * (x * y - z * w), 2.0 * (x * z + y * w),
        2.0 * (x * y + z * w), 1.0 - 2.0 * (x * x + z * z), 2.0 * (y * z - x * w),
        2.0 * (x * z - y * w), 2.0 * (y * z + x * w), 1.0 - 2.0 * (x * x + y * y),
    ], axis=-1)
    return rot.reshape(q.shape[:-1] + (3, 3))


def make_grid(res):
    """Matches the module buffer: grid[d, h, w] = (x(w), y(h), z(d)); flattened (R^3, 3)."""
    lin = jnp.linspace(-1.0, 1.0, res, dtype=jnp.float32)
    zg, yg, xg = jnp.meshgrid(lin, lin, lin, indexing="ij")
    return jnp.stack([xg, yg, zg], axis=-1).reshape(-1, 3)


def grid_sample_3d(vol, coords, align_corners=True):
    """Trilinear F.grid_sample with padding_mode='border'.
    vol: (N, D, H, W) f32; coords: (N, P, 3) with (x, y, z) in [-1, 1]  ->  (N, P).
    TODO(synk): the per-voxel data-dependent gather stays in plain JAX / XLA; a
    future Pallas kernel keeping each (R,R,R) volume resident in VMEM and fusing
    the trilinear gather with the mix kernel is the highest-value follow-up.
    align_corners=True matches the module's linspace(-1,1,R) grid convention
    (modern PyTorch default for an unspecified arg is False — verify vs source).
    """
    D, H, W = vol.shape[-3:]
    x, y, z = coords[..., 0], coords[..., 1], coords[..., 2]

    def unnorm(c, size):
        if align_corners:
            return (c + 1.0) * 0.5 * (size - 1)
        return ((c + 1.0) * size - 1.0) * 0.5

    ix = jnp.clip(unnorm(x, W), 0.0, W - 1.0)
    iy = jnp.clip(unnorm(y, H), 0.0, H - 1.0)
    iz = jnp.clip(unnorm(z, D), 0.0, D - 1.0)

    ix0f, iy0f, iz0f = jnp.floor(ix), jnp.floor(iy), jnp.floor(iz)
    fx, fy, fz = ix - ix0f, iy - iy0f, iz - iz0f
    ix0, iy0, iz0 = ix0f.astype(jnp.int32), iy0f.astype(jnp.int32), iz0f.astype(jnp.int32)
    ix1 = jnp.minimum(ix0 + 1, W - 1)
    iy1 = jnp.minimum(iy0 + 1, H - 1)
    iz1 = jnp.minimum(iz0 + 1, D - 1)

    vol_flat = vol.reshape(vol.shape[0], -1)          # (N, D*H*W)

    def gather(zc, yc, xc):
        idx = (zc * H + yc) * W + xc
        return jnp.take_along_axis(vol_flat, idx, axis=-1)

    c000, c001 = gather(iz0, iy0, ix0), gather(iz0, iy0, ix1)
    c010, c011 = gather(iz0, iy1, ix0), gather(iz0, iy1, ix1)
    c100, c101 = gather(iz1, iy0, ix0), gather(iz1, iy0, ix1)
    c110, c111 = gather(iz1, iy1, ix0), gather(iz1, iy1, ix1)

    c00 = c000 * (1.0 - fx) + c001 * fx
    c01 = c010 * (1.0 - fx) + c011 * fx
    c10 = c100 * (1.0 - fx) + c101 * fx
    c11 = c110 * (1.0 - fx) + c111 * fx
    c0 = c00 * (1.0 - fy) + c01 * fy
    c1 = c10 * (1.0 - fy) + c11 * fy
    return c0 * (1.0 - fz) + c1 * fz


# ----------------------------------------------------------------------------
# tiling helpers
# ----------------------------------------------------------------------------

def _round_up(x, m):
    return ((x + m - 1) // m) * m


def _choose_tile(total, max_tile, min_steps=1):
    """Pick (tile, n_steps, padded_total) for one streamed lane axis.

    * tile is lane-dense (multiple of 128) whenever the axis is split.
    * the max_tile cap is ALWAYS honored (fixes the old full-axis fallback that
      could VMEM-OOM on v7x for non-128-divisible axes).
    * min_steps >= 2 forces >= 2 grid steps so a "parallel" axis has something
      to shard across v7x's two TensorCores.
    * prefers an exact divisor (no padding); otherwise the caller zero-pads to
      n_steps * tile and slices the output back.
    """
    if min_steps <= 1 and total <= max_tile:
        return total, 1, total                       # whole axis, one step
    if total % 128 == 0:
        for steps in range(max(min_steps, 1), total // 128 + 1):
            tile = total // steps
            if total % steps == 0 and tile % 128 == 0 and tile <= max_tile:
                return tile, steps, total
    # fallback: padded / uniform tiles honoring the cap
    tile = min(max_tile, _round_up(-(-total // max(min_steps, 1)), 128))
    tile = max(128, (tile // 128) * 128)
    steps = -(-total // tile)
    return tile, steps, steps * tile


# ----------------------------------------------------------------------------
# Pallas kernel 1: weightbranch  exp(leaky_relu(x@W1+b1) @ W2 + b2)
# ----------------------------------------------------------------------------

def _weightbranch_kernel(x_ref, w1_ref, b1_ref, w2_ref, b2_ref, o_ref):
    # Tiny first layer recomputed per output tile (free filler under the W2 DMA).
    # Do NOT hoist behind pl.when(pid == 0): the grid axis is "parallel" and may
    # be sharded across TensorCores (v7x megacore).
    h = jnp.dot(x_ref[...], w1_ref[...], preferred_element_type=jnp.float32)
    h = h + b1_ref[...]
    h = jnp.where(h > 0, h, 0.2 * h)
    # Second layer: stream W2 (dominant HBM traffic) in its storage dtype (bf16
    # by default), accumulate in f32 on the MXU.
    y = jnp.dot(h.astype(w2_ref.dtype), w2_ref[...],
                preferred_element_type=jnp.float32)
    o_ref[...] = jnp.exp(y + b2_ref[...]).astype(o_ref.dtype)


def weightbranch_forward(encoding, w1, b1, w2, b2, *, max_tile_n=32768):
    B, E = encoding.shape
    H = w1.shape[1]
    F = w2.shape[1]
    # >= 2 grid steps so the second v7x TensorCore can take half the streamed W2.
    min_steps = 2 if F >= 2 * 128 else 1
    tile_n, n_tiles, f_pad = _choose_tile(F, max_tile_n, min_steps=min_steps)
    if f_pad != F:
        w2 = jnp.pad(w2, ((0, 0), (0, f_pad - F)))
        b2 = jnp.pad(b2, ((0, f_pad - F),))

    out = pl.pallas_call(
        _weightbranch_kernel,
        out_shape=jax.ShapeDtypeStruct((B, f_pad), jnp.float32),
        grid=(n_tiles,),
        in_specs=[
            pl.BlockSpec((B, E), lambda j: (0, 0)),        # encoding (resident)
            pl.BlockSpec((E, H), lambda j: (0, 0)),        # W1 (resident)
            pl.BlockSpec((1, H), lambda j: (0, 0)),        # b1 (resident)
            pl.BlockSpec((H, tile_n), lambda j: (0, j)),   # W2 tile (streamed)
            pl.BlockSpec((1, tile_n), lambda j: (0, j)),   # b2 tile (streamed)
        ],
        out_specs=pl.BlockSpec((B, tile_n), lambda j: (0, j)),
        compiler_params=pltpu.CompilerParams(
            dimension_semantics=("parallel",),     # v7x: shard F tiles over 2 TCs
            vmem_limit_bytes=32 * 1024 * 1024),    # portable floor; footprint ~9 MiB
    )(encoding, w1, b1.reshape(1, H), w2, b2.reshape(1, f_pad))
    return out[:, :F] if f_pad != F else out


# ----------------------------------------------------------------------------
# Pallas kernel 2: fused coordinate-field + normalized weighted mix
#
#   coords[b,c,k,v] = sum_j M[b,k,c,j] * grid[j,v] + toff[b,k,c]
#   warp[b,c,v]     = sum_k ww[b,k,v] * coords[b,c,k,v]
#                     / max(sum_k ww[b,k,v], 0.001)
#
# The tiny packed parameters P (12, K) are laid out so that
#   P[j*3 + c, k] = M[b,k,c,j]   (j = 0..2)   and   P[9 + c, k] = toff[b,k,c],
# letting the K-contraction run as one small MXU matmul and the rest as a few
# contiguous-sublane-slice FMAs (no concatenate, no per-channel loop).
# ----------------------------------------------------------------------------

def _mix_kernel(ww_ref, grid_ref, p_ref, o_ref):
    w = ww_ref[0]                                       # (K, tv)   streamed
    g = grid_ref[...]                                   # (3, tv)   rows x, y, z
    s = jnp.dot(p_ref[0], w, preferred_element_type=jnp.float32)   # (12, tv) MXU
    num = s[0:3] * g[0:1] + s[3:6] * g[1:2] + s[6:9] * g[2:3] + s[9:12]   # (3, tv)
    inv = pl.reciprocal(jnp.maximum(jnp.sum(w, axis=0, keepdims=True), 0.001),
                        approx=True)                    # EUP slot, (1, tv)
    o_ref[0] = num * inv


def mix_forward(warpedweight, grid_cf, packed_params, *, max_tile_v=32768):
    """warpedweight: (B, K, V) f32, grid_cf: (3, V) f32, packed_params: (B, 12, K)
    ->  (B, 3, V) f32 (channel-first, so the final reshape is the PyTorch permute)."""
    B, K, V = warpedweight.shape
    # When B == 1 the batch grid axis cannot feed v7x's second core; split V instead.
    min_steps = 2 if (B == 1 and V >= 2 * 128) else 1
    tile_v, n_tiles, v_pad = _choose_tile(V, max_tile_v, min_steps=min_steps)
    if v_pad != V:
        warpedweight = jnp.pad(warpedweight, ((0, 0), (0, 0), (0, v_pad - V)))
        grid_cf = jnp.pad(grid_cf, ((0, 0), (0, v_pad - V)))

    out = pl.pallas_call(
        _mix_kernel,
        out_shape=jax.ShapeDtypeStruct((B, 3, v_pad), jnp.float32),
        grid=(B, n_tiles),
        in_specs=[
            pl.BlockSpec((1, K, tile_v), lambda b, v: (b, 0, v)),   # warpedweight
            pl.BlockSpec((3, tile_v), lambda b, v: (0, v)),         # grid (channel-first)
            pl.BlockSpec((1, 12, K), lambda b, v: (b, 0, 0)),       # packed affine params
        ],
        out_specs=pl.BlockSpec((1, 3, tile_v), lambda b, v: (b, 0, v)),
        compiler_params=pltpu.CompilerParams(
            dimension_semantics=("parallel", "parallel"),
            vmem_limit_bytes=32 * 1024 * 1024),
    )(warpedweight, grid_cf, packed_params)
    return out[:, :, :V] if v_pad != V else out


# ----------------------------------------------------------------------------
# full forward (matches AffineMixWarp.forward)
# ----------------------------------------------------------------------------

def affine_mix_warp_forward(encoding, params, grid_flat, n_affine_basis, res_affine,
                            *, stream_weights_bf16=True, align_corners=True):
    B = encoding.shape[0]
    K, R = n_affine_basis, res_affine
    V = R ** 3

    # Small affine-parameter heads: plain JAX.
    warps = dense_head(encoding, *params["warps"]).reshape(B, K, 3)
    warpr = dense_head(encoding, *params["warpr"]).reshape(B, K, 4)
    warpt = dense_head(encoding, *params["warpt"]).reshape(B, K, 3) * 0.1
    warprot = quaternion_to_rotmat(warpr.reshape(-1, 4)).reshape(B, K, 3, 3)

    # weightbranch (Pallas kernel #1) with exp fused.
    w1, b1, w2, b2 = params["weightbranch"]
    if stream_weights_bf16:
        w2 = w2.astype(jnp.bfloat16)   # halves the dominant HBM traffic; f32 accumulate
    weight = weightbranch_forward(encoding, w1, b1, w2, b2).reshape(B, K, V)

    # Affine map folded into M (scale*rotation) and toff (precomposed translation):
    #   coords[b,k,v,c] = sum_j M[b,k,c,j] * grid[v,j] + toff[b,k,c]
    M = warps[..., :, None] * warprot                              # (B, K, 3, 3)
    toff = -jnp.einsum("bkcj,bkj->bkc", M, warpt)                  # (B, K, 3)

    # Sampling coordinates for grid_sample only (the mix kernel regenerates its own
    # channel-first coords in-kernel, so no (B,3,K,V) transpose/re-read exists).
    coords = jnp.einsum("vj,bkcj->bkvc", grid_flat, M) + toff[:, :, None, :]

    # TODO(synk): F.grid_sample's trilinear border-padded gather stays in XLA; fusing
    # it (VMEM-resident (R,R,R) volumes) with the mix kernel is the top follow-up.
    warpedweight = grid_sample_3d(
        weight.reshape(B * K, R, R, R), coords.reshape(B * K, V, 3),
        align_corners=align_corners).reshape(B, K, V)

    # Pack tiny params for the fused mix kernel: rows [j*3+c] = M, rows [9+c] = toff.
    packed = jnp.concatenate(
        [jnp.transpose(M, (0, 3, 2, 1)).reshape(B, 9, K),          # (B, 9, K)
         jnp.transpose(toff, (0, 2, 1))], axis=1)                  # (B, 12, K)
    grid_cf = grid_flat.T                                          # (3, V) lane-dense

    warp = mix_forward(warpedweight, grid_cf, packed)              # (B, 3, V)
    return warp.reshape(B, 3, R, R, R)


# ----------------------------------------------------------------------------
# pure-JAX reference (mirrors the PyTorch math)
# ----------------------------------------------------------------------------

def affine_mix_warp_ref(encoding, params, grid_flat, n_affine_basis, res_affine,
                        *, stream_weights_bf16=True, align_corners=True):
    B = encoding.shape[0]
    K, R = n_affine_basis, res_affine
    V = R ** 3
    warps = dense_head(encoding, *params["warps"]).reshape(B, K, 3)
    warpr = dense_head(encoding, *params["warpr"]).reshape(B, K, 4)
    warpt = dense_head(encoding, *params["warpt"]).reshape(B, K, 3) * 0.1
    warprot = quaternion_to_rotmat(warpr.reshape(-1, 4)).reshape(B, K, 3, 3)

    w1, b1, w2, b2 = params["weightbranch"]
    h = leaky_relu(encoding @ w1 + b1)
    if stream_weights_bf16:
        h = h.astype(jnp.bfloat16).astype(jnp.float32)
        w2 = w2.astype(jnp.bfloat16).astype(jnp.float32)
    weight = jnp.exp(h @ w2 + b2).reshape(B, K, V)

    gmt = grid_flat[None, None] - warpt[:, :, None, :]
    coords = jnp.einsum("bkvj,bkcj->bkvc", gmt, warprot) * warps[:, :, None, :]
    ww = grid_sample_3d(weight.reshape(B * K, R, R, R), coords.reshape(B * K, V, 3),
                        align_corners=align_corners).reshape(B, K, V)
    num = jnp.sum(ww[..., None] * coords, axis=1)                  # (B, V, 3)
    den = jnp.maximum(jnp.sum(ww, axis=1), 0.001)[..., None]
    warp = (num / den).reshape(B, R, R, R, 3)
    return jnp.transpose(warp, (0, 4, 1, 2, 3))


# ----------------------------------------------------------------------------
# synthetic parameters
# ----------------------------------------------------------------------------

def init_linear(key, fan_in, fan_out, w_scale=None, b_scale=0.01):
    kw, kb = jax.random.split(key)
    s = (1.0 / fan_in ** 0.5) if w_scale is None else w_scale
    w = jax.random.normal(kw, (fan_in, fan_out), jnp.float32) * s
    b = jax.random.normal(kb, (fan_out,), jnp.float32) * b_scale
    return w, b


def init_params(key, n_affine_basis, res_affine):
    # TODO(synk): models.utils.initseq is an external init scheme; plain scaled-normal here.
    K, R = n_affine_basis, res_affine
    ks = jax.random.split(key, 8)
    return {
        "warps": init_linear(ks[0], 256, 128) + init_linear(ks[1], 128, 3 * K, w_scale=0.05),
        "warpr": init_linear(ks[2], 256, 128) + init_linear(ks[3], 128, 4 * K, w_scale=0.05),
        "warpt": init_linear(ks[4], 256, 128) + init_linear(ks[5], 128, 3 * K, w_scale=0.05),
        "weightbranch": init_linear(ks[6], 256, 64) + init_linear(ks[7], 64, K * R ** 3, w_scale=0.05),
    }


if __name__ == "__main__":
    B, E = 2, 256          # the module hardcodes Linear(256, ...) -> encoding dim 256
    K, R = 4, 16           # small n_affine_basis / res_affine for the smoke test

    key = jax.random.PRNGKey(0)
    kenc, kpar = jax.random.split(key)
    encoding = jax.random.normal(kenc, (B, E), jnp.float32)
    params = init_params(kpar, K, R)
    grid_flat = make_grid(R)

    out = affine_mix_warp_forward(encoding, params, grid_flat, K, R)
    out = jax.block_until_ready(out)
    assert out.shape == (B, 3, R, R, R)

    ref = affine_mix_warp_ref(encoding, params, grid_flat, K, R)
    err = float(jnp.max(jnp.abs(out - ref)))
    assert jnp.allclose(out, ref, atol=1e-2, rtol=1e-2), f"max abs err {err}"

    print("KERNEL_OK")
</pallas_src>

<mosaic_0001>
module attributes {stable_mosaic.version = 11 : i64} {
  func.func @_weightbranch_kernel(%arg0: i32, %arg1: memref<2x256xf32, #tpu.memory_space<vmem>>, %arg2: memref<256x64xf32, #tpu.memory_space<vmem>>, %arg3: memref<1x64xf32, #tpu.memory_space<vmem>>, %arg4: memref<64x8192xbf16, #tpu.memory_space<vmem>>, %arg5: memref<1x8192xf32, #tpu.memory_space<vmem>>, %arg6: memref<2x8192xf32, #tpu.memory_space<vmem>>) attributes {dimension_semantics = [#tpu.dimension_semantics<parallel>], iteration_bounds = array<i64: 2>, scalar_prefetch = 0 : i64, scratch_operands = 0 : i64, tpu.core_type = #tpu.core_type<tc>, window_params = [{pipeline_mode = #tpu.pipeline_mode<synchronous>, transform_indices = @transform_0, window_bounds = array<i64: 2, 256>}, {pipeline_mode = #tpu.pipeline_mode<synchronous>, transform_indices = @transform_1, window_bounds = array<i64: 256, 64>}, {pipeline_mode = #tpu.pipeline_mode<synchronous>, transform_indices = @transform_2, window_bounds = array<i64: 1, 64>}, {transform_indices = @transform_3, window_bounds = array<i64: 64, 8192>}, {transform_indices = @transform_4, window_bounds = array<i64: 1, 8192>}, {transform_indices = @transform_5, window_bounds = array<i64: 2, 8192>}]} {
    %c0 = arith.constant 0 : index
    %c0_0 = arith.constant 0 : index
    %0 = vector.load %arg1[%c0, %c0_0] : memref<2x256xf32, #tpu.memory_space<vmem>>, vector<2x256xf32>
    %c0_1 = arith.constant 0 : index
    %c0_2 = arith.constant 0 : index
    %1 = vector.load %arg2[%c0_1, %c0_2] : memref<256x64xf32, #tpu.memory_space<vmem>>, vector<256x64xf32>
    %cst = arith.constant dense<0.000000e+00> : vector<2x64xf32>
    %2 = tpu.matmul %0, %1, %cst {dimension_numbers = #tpu.dot_dimension_numbers<[1], [0], [0], [1], [0, 0, 1, 1], [], []>} : vector<2x256xf32>, vector<256x64xf32>, vector<2x64xf32> -> vector<2x64xf32>
    %c0_3 = arith.constant 0 : index
    %c0_4 = arith.constant 0 : index
    %3 = vector.load %arg3[%c0_3, %c0_4] : memref<1x64xf32, #tpu.memory_space<vmem>>, vector<1x64xf32>
    %4 = vector.broadcast %3 : vector<1x64xf32> to vector<2x64xf32>
    %5 = arith.addf %2, %4 : vector<2x64xf32>
    %cst_5 = arith.constant 0.000000e+00 : f32
    %6 = vector.broadcast %cst_5 : f32 to vector<2x64xf32>
    %7 = arith.cmpf ogt, %5, %6 : vector<2x64xf32>
    %cst_6 = arith.constant 2.000000e-01 : f32
    %8 = vector.broadcast %cst_6 : f32 to vector<2x64xf32>
    %9 = arith.mulf %8, %5 : vector<2x64xf32>
    %10 = arith.select %7, %5, %9 : vector<2x64xi1>, vector<2x64xf32>
    %11 = arith.truncf %10 : vector<2x64xf32> to vector<2x64xbf16>
    %c0_7 = arith.constant 0 : index
    %c0_8 = arith.constant 0 : index
    %12 = vector.load %arg4[%c0_7, %c0_8] : memref<64x8192xbf16, #tpu.memory_space<vmem>>, vector<64x8192xbf16>
    %cst_9 = arith.constant dense<0.000000e+00> : vector<2x8192xf32>
    %13 = tpu.matmul %11, %12, %cst_9 {dimension_numbers = #tpu.dot_dimension_numbers<[1], [0], [0], [1], [0, 0, 1, 1], [], []>} : vector<2x64xbf16>, vector<64x8192xbf16>, vector<2x8192xf32> -> vector<2x8192xf32>
    %c0_10 = arith.constant 0 : index
    %c0_11 = arith.constant 0 : index
    %14 = vector.load %arg5[%c0_10, %c0_11] : memref<1x8192xf32, #tpu.memory_space<vmem>>, vector<1x8192xf32>
    %15 = vector.broadcast %14 : vector<1x8192xf32> to vector<2x8192xf32>
    %16 = arith.addf %13, %15 : vector<2x8192xf32>
    %17 = math.exp %16 : vector<2x8192xf32>
    %c0_12 = arith.constant 0 : index
    %c0_13 = arith.constant 0 : index
    %18 = vector.load %arg6[%c0_12, %c0_13] : memref<2x8192xf32, #tpu.memory_space<vmem>>, vector<2x8192xf32>
    tpu.vector_store %arg6[%c0_12, %c0_13], %17 {strides = array<i32>} : memref<2x8192xf32, #tpu.memory_space<vmem>>, vector<2x8192xf32>,
    return
  }
  func.func @transform_0(%arg0: i32) -> (i32, i32) {
    %c0_i32 = arith.constant 0 : i32
    %c0_i32_0 = arith.constant 0 : i32
    %c0_i32_1 = arith.constant 0 : i32
    return %c0_i32, %c0_i32_0 : i32, i32
  }
  func.func @transform_1(%arg0: i32) -> (i32, i32) {
    %c0_i32 = arith.constant 0 : i32
    %c0_i32_0 = arith.constant 0 : i32
    %c0_i32_1 = arith.constant 0 : i32
    return %c0_i32, %c0_i32_0 : i32, i32
  }
  func.func @transform_2(%arg0: i32) -> (i32, i32) {
    %c0_i32 = arith.constant 0 : i32
    %c0_i32_0 = arith.constant 0 : i32
    %c0_i32_1 = arith.constant 0 : i32
    return %c0_i32, %c0_i32_0 : i32, i32
  }
  func.func @transform_3(%arg0: i32) -> (i32, i32) {
    %c0_i32 = arith.constant 0 : i32
    %c0_i32_0 = arith.constant 0 : i32
    return %c0_i32, %arg0 : i32, i32
  }
  func.func @transform_4(%arg0: i32) -> (i32, i32) {
    %c0_i32 = arith.constant 0 : i32
    %c0_i32_0 = arith.constant 0 : i32
    return %c0_i32, %arg0 : i32, i32
  }
  func.func @transform_5(%arg0: i32) -> (i32, i32) {
    %c0_i32 = arith.constant 0 : i32
    %c0_i32_0 = arith.constant 0 : i32
    return %c0_i32, %arg0 : i32, i32
  }
}

</mosaic_0001>

<bundles_post_ra>
// kernel: tpu_custom_call.1
= control target key start
LH: loop header
LB: loop body
LE: loop exit
PB: predicated region body
PF: predicated region fallthrough
CT: control target
= control target key end

     0   :  { %s6128_s0 = inlined_call_operand.hbm [shape: f32[2,256], index: 0, kind: input, shape index: {}]   ;;  %s6129_s1 = inlined_call_operand.vmem [shape: f32[256,64], index: 1, kind: input, shape index: {}]   ;;  %s6130_s2 = inlined_call_operand.hbm [shape: f32[1,64], index: 2, kind: input, shape index: {}]   ;;  %s6131_s3 = inlined_call_operand.hbm [shape: bf16[64,16384], index: 3, kind: input, shape index: {}]   ;;  %s6132_s4 = inlined_call_operand.hbm [shape: f32[1,16384], index: 4, kind: input, shape index: {}]   ;;  %s6133_s5 = inlined_call_operand.hbm [shape: f32[2,16384], index: 5, kind: output, shape index: {}]  }
   0x1   :  { %6146 = sst [smem:[#allocation17_spill]] %s6128_s0 }
   0x2   :  { %6147 = sst [smem:[#allocation18_spill]] %s6131_s3 }
   0x3   :  { %10 = vsyncpa [#allocation3], 0 }
   0x4   :  { %11 = vsyncpa [#allocation6], 0 }
   0x5   :  { %12 = vsyncpa [#allocation4], 0 }
   0x6   :  { %14 = vsyncpa [#allocation4 + $0x1], 0  ;;  %s5057_s18 = smov 0   ;;  %s5059_s19 = smov 0  }
   0x7   :  { %s5061_s20 = smov 0   ;;  %s5063_s21 = smov 0  }
   0x8 LB: > { %s5078_s22 = sadd.s32 4294967295, %s5015_s21   ;;  %s4238_s23 = sadd.s32 4294967294, %s5015_s21   ;;  %s5015_s21 = sphi %s5063_s21, %s6178_s21   ;;  %s5011_s20 = sphi %s5061_s20, %s6182_s20   ;;  %s5007_s19 = sphi %s5059_s19, %s6181_s19   ;;  %s5003_s18 = sphi %s5057_s18, %s6180_s18  }
   0x9   : > { %s5082_s24 = sadd.s32 1, %s5015_s21   ;;  %s90_s25 = sadd.s32 1, %s5011_s20 }
   0xa   : > { %6148 = sst [smem:[#allocation14_spill]] %s5082_s24  ;;  %s87_s26 = ssub.s32 %s5015_s21, %s5082_s24 }
   0xb   : > { %p97_p0 = scmp.ne.s32.totalorder %s5011_s20, %s5007_s19  ;;  %p88_p1 = scmp.eq.s32.totalorder %s87_s26, 0 }
   0xc   : > { %p98_p2 = scmp.eq.s32.totalorder %s5015_s21, 0  ;;  %p103_p3 = scmp.ne.s32.totalorder %s5007_s19, %s5003_s18 }
   0xd   : > { %p6134_p4 = scmp.eq.s32.totalorder %s5078_s22, 0  ;;  %p153_p7 = scmp.eq.s32.totalorder %s5078_s22, 1 }
   0xe   : > { %s5094_s27 = scalar_select %p88_p1, %s5011_s20, %s90_s25  }
   0xf   : > { %p5096_p5 = por %p98_p2, %p97_p0  ;;  %p5102_p6 = por %p6134_p4, %p103_p3 }
  0x10   : > { %6149 = sst [smem:[#allocation15_spill]] %s5094_s27  ;;  %p159_p8 = scmp.eq.s32.totalorder %s4238_s23, 1 }
  0x11   : > { %s6151_s29 = scalar_select %p5102_p6, 1, 0 }
  0x12   : > { %p4239_p9 = scmp.ge.s32.totalorder %s5015_s21, 1  ;;  %p166_p10 = scmp.lt.s32.totalorder %s5015_s21, 3 }
  0x13   : > { %p5109_p11 = por %p153_p7, %p97_p0  ;;  %p5113_p12 = por %p159_p8, %p103_p3 }
  0x14   : > { %p5117_p13 = pnand %p4239_p9, %p166_p10  ;;  %s5017_s8 = smov [#allocation2]  }
  0x15   : > { %s6152_s30 = scalar_select %p5109_p11, 1, 0 }
  0x16   : > { %s6153_s6 = scalar_select %p5113_p12, 1, 0 }
  0x17   : > { %s6155_s7 = scalar_select %p5117_p13, 1, 0 }
  0x18   : > { %6154 = sst [smem:[#allocation16_spill]] %s6153_s6  ;;  %p4634_p2 = pneg %p5117_p13 }
  0x19   : > { %s179_s9 = sshll.u32 %s5017_s8, 4  ;;  %p4654_p4 = scmp.lt.s32.totalorder %s5015_s21, 2  ;;  %s180_s9 = int_to_ptr.vmem [resolvable:$true] %s179_s9 }
  0x1a   : > { %p6156_p0 = scmp.eq.s32.totalorder %s5078_s22, 0  ;;  %s204_s11 = sand.u32 1, %s5015_s21  }
  0x1b   : > { %p5134_p3 = pnand %p4654_p4, %p5096_p5  ;;  %s6139_s13 = sand.u32 1, %s5011_s20  }
  0x1c   : > { %p5127_p7 = pnand %p4634_p2, %p6156_p0  ;;  %s6159_s0 = sld [smem:[#allocation17_spill]] }
  0x1d   : > { %s6158_s12 = scalar_select %p5134_p3, 1, 0 }
  0x1e   : > { %p6140_p9 = pneg %p5127_p7 }
  0x22   : > { %s4825_s16 = scalar_lea.hbm %s6159_s0, 64 }
  0x23   : > { %p4826_p8 = scmp.ne.s32.totalorder %s6159_s0, %s4825_s16  ;;  %p4832_p4 = scmp.lt.u32.totalorder %s4825_s16, %s6159_s0 }
  0x25   : > { %p4828_p10 = pnand %p6140_p9, %p4826_p8 }
  0x27   : > { %p4829_p2 = pneg %p4828_p10 }
  0x29   : > { %p4834_p5 = pnand %p4832_p4, %p4829_p2 }
  0x2b   : > { %4837 = shalt.err (!%p4834_p5)
}
  0x2c   : > { %s4838_s28 = scalar_lea.vmem %s180_s9, 64  ;;  %p4846_p11 = scmp.lt.s32.totalorder %s180_s9, %s180_s9 }
  0x2d   : > { %p4839_p0 = scmp.ne.s32.totalorder %s180_s9, %s4838_s28  ;;  %p4847_p6 = scmp.lt.s32.totalorder %s4838_s28, %s4838_s28 }
  0x2f   : > { %p4841_p1 = pnand %p4839_p0, %p6140_p9  ;;  %p4848_p13 = por %p4847_p6, %p4846_p11 }
  0x31   : > { %p4842_p12 = pneg %p4841_p1 }
  0x33   : > { %p4849_p3 = pnand %p4848_p13, %p4842_p12 }
  0x35   : > { %4852 = shalt.err (!%p4849_p3)
}
  0x36   : > { %4637 = dma.hbm_to_vmem [thread:$0]  (!%p5127_p7), %s6159_s0, 64, %s180_s9, [#allocation3]  }
  0x37   : > { %s4243_s15 = sshll.u32 %s6139_s13, 11  ;;  %s4550_s16 = sshll.u32 %s5015_s21, 12 }
  0x38   : > { %s6160_s3 = sld [smem:[#allocation18_spill]]  ;;  %s208_s26 = scalar_lea.vmem [#allocation7], %s4243_s15 }
  0x39   : > { %s215_s28 = sshll.u32 %s208_s26, 4  ;;  %s5171_s8 = scalar_lea.sflag [#allocation3], %s204_s11  ;;  %s5169_s28 = int_to_ptr.vmem [resolvable:$true] %s215_s28 }
  0x3a   : > { %p6161_p11 = scmp.ne.s32.totalorder %s6158_s12, 0 }
  0x3c   : > { %p6144_p12 = pneg %p6161_p11 }
  0x3e   : > { %s5167_s25 = scalar_lea.hbm %s6160_s3, %s4550_s16  ;;  %s4858_s17 = scalar_lea.hbm %s6160_s3, 65536 }
  0x3f   : > { %s4853_s14 = scalar_lea.hbm %s5167_s25, 32768  ;;  %p4859_p3 = scmp.lt.u32.totalorder %s5167_s25, %s6160_s3 }
  0x40   : > { %p4854_p6 = scmp.ne.s32.totalorder %s5167_s25, %s4853_s14  ;;  %p4860_p8 = scmp.lt.u32.totalorder %s4858_s17, %s4853_s14 }
  0x41   : > { %p4862_p2 = scmp.lt.u32.totalorder %s4853_s14, %s5167_s25 }
  0x42   : > { %p4856_p13 = pnand %p6144_p12, %p4854_p6  ;;  %p4861_p10 = por %p4860_p8, %p4859_p3 }
  0x44   : > { %p4857_p1 = pneg %p4856_p13  ;;  %p4863_p4 = por %p4862_p2, %p4861_p10 }
  0x46   : > { %p4864_p5 = pnand %p4863_p4, %p4857_p1 }
  0x48   : > { %4867 = shalt.err (!%p4864_p5)
}
  0x49   : > { %s4868_s11 = scalar_lea.vmem %s5169_s28, 32768  ;;  %s5018_s15 = smov [#allocation7]  }
  0x4a   : > { %p4869_p0 = scmp.ne.s32.totalorder %s5169_s28, %s4868_s11  ;;  %s4873_s26 = sshll.u32 %s5018_s15, 4  ;;  %s4874_s26 = int_to_ptr.vmem [resolvable:$false] %s4873_s26 }
  0x4b   : > { %s4875_s13 = scalar_lea.vmem %s4874_s26, 65536  ;;  %p4876_p9 = scmp.lt.s32.totalorder %s5169_s28, %s4874_s26 }
  0x4c   : > { %p4871_p6 = pnand %p4869_p0, %p6144_p12  ;;  %p4877_p3 = scmp.lt.s32.totalorder %s4875_s13, %s4868_s11 }
  0x4e   : > { %p4872_p13 = pneg %p4871_p6  ;;  %p4878_p8 = por %p4877_p3, %p4876_p9 }
  0x50   : > { %p4879_p10 = pnand %p4878_p8, %p4872_p13 }
  0x52   : > { %4882 = shalt.err (!%p4879_p10)
}
  0x53   : > { %s5019_s14 = smov 8192   ;;  %s5020_s9 = smov 4096  }
  0x54   : > { %s5021_s16 = smov 256   ;;  %s6162_s17 = sand.u32 1, %s5011_s20  }
  0x55   : > { %4644 = dma.hbm_to_vmem [thread:$0]  (!%p6161_p11), %s5167_s25, 32768, %s5169_s28, %s5171_s8, %s5019_s14, %s5020_s9, %s5021_s16  }
  0x56   : > { %s4246_s23 = sshll.u32 %s6162_s17, 6  ;;  %s5022_s15 = smov [#allocation5]  }
  0x57   : > { %s193_s26 = sshll.u32 %s5022_s15, 4  ;;  %s4551_s11 = sshll.u32 %s5015_s21, 10  ;;  %s194_s26 = int_to_ptr.vmem [resolvable:$true] %s193_s26 }
  0x58   : > { %s4883_s3 = scalar_lea.hbm %s6130_s2, 16  ;;  %p6163_p1 = pneg %p5127_p7 }
  0x59   : > { %p4884_p9 = scmp.ne.s32.totalorder %s6130_s2, %s4883_s3  ;;  %p4890_p5 = scmp.lt.u32.totalorder %s4883_s3, %s6130_s2 }
  0x5b   : > { %p4886_p2 = pnand %p4884_p9, %p6163_p1 }
  0x5d   : > { %p4887_p4 = pneg %p4886_p2 }
  0x5f   : > { %p4892_p0 = pnand %p4890_p5, %p4887_p4 }
  0x61   : > { %4895 = shalt.err (!%p4892_p0)
}
  0x62   : > { %s4896_s28 = scalar_lea.vmem %s194_s26, 16  ;;  %p6164_p13 = pmov %p6163_p1 }
  0x63   : > { %p4897_p6 = scmp.ne.s32.totalorder %s194_s26, %s4896_s28  ;;  %s4903_s0 = scalar_lea.vmem %s194_s26, 32 }
  0x64   : > { %p4904_p10 = scmp.lt.s32.totalorder %s194_s26, %s194_s26  ;;  %p4905_p12 = scmp.lt.s32.totalorder %s4903_s0, %s4896_s28 }
  0x65   : > { %p4899_p3 = pnand %p4897_p6, %p6164_p13 }
  0x66   : > { %p4906_p11 = por %p4905_p12, %p4904_p10 }
  0x67   : > { %p4900_p8 = pneg %p4899_p3 }
  0x69   : > { %p4907_p1 = pnand %p4906_p11, %p4900_p8 }
  0x6b   : > { %4910 = shalt.err (!%p4907_p1)
}
  0x6c   : > { %4640 = dma.hbm_to_vmem [thread:$0]  (!%p5127_p7), %s6130_s2, 16, %s194_s26, [#allocation6]  }
  0x6d   : > { %s5225_s14 = scalar_lea.hbm %s6132_s4, %s4551_s11  ;;  %s229_s9 = scalar_lea.vmem [#allocation8], %s4246_s23 }
  0x6e   : > { %s237_s16 = sshll.u32 %s229_s9, 4  ;;  %s4911_s17 = scalar_lea.hbm %s5225_s14, 1024  ;;  %s238_s16 = int_to_ptr.vmem [resolvable:$true] %s237_s16 }
  0x6f   : > { %p4912_p11 = scmp.ne.s32.totalorder %s5225_s14, %s4911_s17  ;;  %p6165_p12 = scmp.ne.s32.totalorder %s6158_s12, 0 }
  0x70   : > { %s4916_s26 = scalar_lea.hbm %s6132_s4, 2048  ;;  %p4917_p7 = scmp.lt.u32.totalorder %s5225_s14, %s6132_s4 }
  0x71   : > { %p6166_p9 = pneg %p6165_p12  ;;  %p4918_p5 = scmp.lt.u32.totalorder %s4916_s26, %s4911_s17 }
  0x72   : > { %p4920_p6 = scmp.lt.u32.totalorder %s4911_s17, %s5225_s14 }
  0x73   : > { %p4914_p2 = pnand %p4912_p11, %p6166_p9  ;;  %p4919_p0 = por %p4918_p5, %p4917_p7 }
  0x75   : > { %p4915_p4 = pneg %p4914_p2  ;;  %p4921_p13 = por %p4920_p6, %p4919_p0 }
  0x77   : > { %p4922_p3 = pnand %p4921_p13, %p4915_p4 }
  0x79   : > { %4925 = shalt.err (!%p4922_p3)
}
  0x7a   : > { %s4926_s23 = scalar_lea.vmem %s238_s16, 1024  ;;  %p6167_p10 = pmov %p6166_p9 }
  0x7b   : > { %p4927_p8 = scmp.ne.s32.totalorder %s238_s16, %s4926_s23  ;;  %s5023_s25 = smov [#allocation8]  }
  0x7c   : > { %s4931_s28 = sshll.u32 %s5023_s25, 4  ;;  %s4932_s28 = int_to_ptr.vmem [resolvable:$false] %s4931_s28 }
  0x7d   : > { %p4929_p1 = pnand %p4927_p8, %p6167_p10  ;;  %s4933_s0 = scalar_lea.vmem %s4932_s28, 2048 }
  0x7e   : > { %p4934_p9 = scmp.lt.s32.totalorder %s238_s16, %s4932_s28  ;;  %p4935_p2 = scmp.lt.s32.totalorder %s4933_s0, %s4926_s23 }
  0x7f   : > { %p4930_p11 = pneg %p4929_p1 }
  0x80   : > { %p4936_p5 = por %p4935_p2, %p4934_p9 }
  0x82   : > { %p4937_p7 = pnand %p4936_p5, %p4930_p11 }
  0x84   : > { %4940 = shalt.err (!%p4937_p7)
}
  0x85   : > { %4647 = dma.hbm_to_vmem [thread:$0]  (!%p6165_p12), %s5225_s14, 1024, %s238_s16, %s5171_s8  }
  0x86   : > { %p6168_p4 = scmp.ne.s32.totalorder %s6155_s7, 0 }
  0x87   : > { %p6169_p0 = scmp.eq.s32.totalorder (!%p6168_p4), %s5078_s22, 0 }
  0x88   : > { %246 = sbr.rel (%p6168_p4) target bundleno = 913 (0x391), region = 40 }
  0x8f   : > { %4986 = dma.done.wait (%p6169_p0), [#allocation3], 64   ;;  %p6170_p6 = pmov %p6169_p0 }
  0x90   : > { %p6171_p13 = pmov %p6169_p0 }
  0x91   : > { %4988 = vsyncadd (%p6170_p6), [#allocation3], 4294967232 }
  0x92   : > { %4990 = dma.done.wait (%p6171_p13), [#allocation6], 16   ;;  %p6172_p3 = pmov %p6169_p0 }
  0x93   : > { %s256_s12 = sand.u32 1, %s5078_s22   ;;  %s5259_s8 = sand.u32 1, %s5007_s19  }
  0x94   : > { %4992 = vsyncadd (%p6172_p3), [#allocation6], 4294967280  ;;  %s4252_s7 = sshll.u32 %s5259_s8, 11  ;;  %s257_s24 = scalar_lea.sflag [#allocation3], %s256_s12 }
  0x95   : > { %s5262_s27 = scalar_lea.vmem [#allocation7], %s4252_s7  ;;  %p6173_p12 = scmp.ne.s32.totalorder %s6151_s29, 0 }
  0x97   : > { %4994 = dma.done.wait (%p6173_p12), %s257_s24, 33792  }
  0x98   : > { %4996 = vsyncadd (%p6173_p12), %s257_s24, 4294933504  ;;  %v322_v0 = vld [vmem:[%s6129_s1 + $0x80] sm:$0xff]  ;;  %v323_v1 = vld [vmem:[%s6129_s1 + $0x88] sm:$0xff]  ;;  %vm2302_vm1 = vcmask 523264   ;;  %s4253_s15 = sshll.u32 %s5259_s8, 6  ;;  %s4254_s29 = sshll.u32 %s5259_s8, 7 }
  0x99   : > { %v306_v2 = vld [vmem:[%s6129_s1] sm:$0xff]  ;;  %v4588_v3 = vpack.c.bf16 %v323_v1, %v322_v0  ;;  %v307_v4 = vld [vmem:[%s6129_s1 + $0x8] sm:$0xff]  ;;  %v324_v5 = vld [vmem:[%s6129_s1 + $0x90] sm:$0xff]  ;;  %s5687_s26 = scalar_lea.vmem [#allocation8], %s4253_s15  ;;  %s4552_s13 = sshll.u32 %s5078_s22, 11 }
  0x9a   : > { %v325_v6 = vld [vmem:[%s6129_s1 + $0x98] sm:$0xff]  ;;  %v4590_v7 = vpack.c.bf16 %v307_v4, %v306_v2  ;;  %v308_v9 = vld [vmem:[%s6129_s1 + $0x10] sm:$0xff]  ;;  %v326_v11 = vld [vmem:[%s6129_s1 + $0xa0] sm:$0xff]  ;;  %s6083_s28 = scalar_lea.hbm %s6133_s5, %s4552_s13  ;;  %s4115_s0 = scalar_lea.sflag [#allocation4], %s5259_s8 }
  0x9b   : > { %v4592_v8 = vpack.c.bf16 %v325_v6, %v324_v5  ;;  %v309_v10 = vld [vmem:[%s6129_s1 + $0x18] sm:$0xff]  ;;  %4589 = vmatprep.subr.bf16.mxu0 %v4588_v3  ;;  %v327_v12 = vld [vmem:[%s6129_s1 + $0xa8] sm:$0xff]  ;;  %v310_v15 = vld [vmem:[%s6129_s1 + $0x20] sm:$0xff]  ;;  %p6174_p10 = scmp.ne.s32.totalorder %s6152_s30, 0  ;;  %s5026_s22 = smov [#allocation9]  }
  0x9c   : > { %4591 = vmatpush3.bf16.msra.mxu0 %v4590_v7  ;;  %v4594_v13 = vpack.c.bf16 %v309_v10, %v308_v9  ;;  %v4596_v14 = vpack.c.bf16 %v327_v12, %v326_v11  ;;  %v311_v16 = vld [vmem:[%s6129_s1 + $0x28] sm:$0xff]  ;;  %v328_v17 = vld [vmem:[%s6129_s1 + $0xb0] sm:$0xff]  ;;  %v329_v18 = vld [vmem:[%s6129_s1 + $0xb8] sm:$0xff]  ;;  %s4945_s7 = sshll.u32 %s5026_s22, 4  ;;  %s4946_s7 = int_to_ptr.vmem [resolvable:$false] %s4945_s7 }
  0x9d   : > { %4593 = vmatprep.subr.bf16.mxu0 %v4592_v8  ;;  %v4598_v19 = vpack.c.bf16 %v311_v16, %v310_v15  ;;  %v4600_v20 = vpack.c.bf16 %v329_v18, %v328_v17  ;;  %v312_v21 = vld [vmem:[%s6129_s1 + $0x30] sm:$0xff]  ;;  %v313_v22 = vld [vmem:[%s6129_s1 + $0x38] sm:$0xff]  ;;  %v330_v23 = vld [vmem:[%s6129_s1 + $0xc0] sm:$0xff]  ;;  %s4947_s24 = scalar_lea.vmem %s4946_s7, 4096 }
  0x9e   : > { %v331_v24 = vld [vmem:[%s6129_s1 + $0xc8] sm:$0xff]  ;;  %v4256_v25 = vld.sshfl [vmem:[#allocation2] sm:$0x33 pattern:$0x76325410]  ;;  %v4602_v29 = vpack.c.bf16 %v313_v22, %v312_v21  ;;  %v332_v38 = vld [vmem:[%s6129_s1 + $0xd0] sm:$0xff] }
  0x9f   : > { %v353_v26 = vcombine.high %v4256_v25, %v4256_v25  ;;  %v430_v27 = vld [vmem:[%s5262_s27] sm:$0xff]  ;;  %v4604_v34 = vpack.c.bf16 %v331_v24, %v330_v23  ;;  %v333_v39 = vld [vmem:[%s6129_s1 + $0xd8] sm:$0xff]  ;;  %v316_v43 = vld [vmem:[%s6129_s1 + $0x50] sm:$0xff] }
  0xa0   : > { %4595 = vmatpush3.bf16.msra.mxu0 %v4594_v13  ;;  %v462_v28 = vld [vmem:[%s5262_s27 + $0x100] sm:$0xff]  ;;  %v4608_v42 = vpack.c.bf16 %v333_v39, %v332_v38  ;;  %v317_v44 = vld [vmem:[%s6129_s1 + $0x58] sm:$0xff]  ;;  %v336_v51 = vld [vmem:[%s6129_s1 + $0xf0] sm:$0xff] }
  0xa1   : > { %4597 = vmatprep.subr.bf16.mxu0 %v4596_v14  ;;  %v4258_v30 = vcombine.high %v430_v27, %v462_v28  ;;  %v4257_v31 = vcombine.low %v430_v27, %v462_v28  ;;  %v494_v32 = vld [vmem:[%s5262_s27 + $0x200] sm:$0xff]  ;;  %420 = vmatprep.mubr.f32.mxu0 %v353_v26  ;;  %v4610_v47 = vpack.c.bf16 %v317_v44, %v316_v43  ;;  %v337_v52 = vld [vmem:[%s6129_s1 + $0xf8] sm:$0xff]  ;;  %v320_v55 = vld [vmem:[%s6129_s1 + $0x70] sm:$0xff]  ;;  %v5024_v26 = vmov 0  }
  0xa2   : > { %v526_v33 = vld [vmem:[%s5262_s27 + $0x300] sm:$0xff]  ;;  %v4616_v54 = vpack.c.bf16 %v337_v52, %v336_v51  ;;  %v321_v56 = vld [vmem:[%s6129_s1 + $0x78] sm:$0xff]  ;;  %v431_v18 = vld [vmem:[%s5262_s27 + $0x8] sm:$0xff]  ;;  %2338 = vmatprep.mubr.bf16.mxu1 %v5024_v26 }
  0xa3   : > { %v314_v35 = vld [vmem:[%s6129_s1 + $0x40] sm:$0xff]  ;;  %v315_v36 = vld [vmem:[%s6129_s1 + $0x48] sm:$0xff]  ;;  %v4322_v37 = vcombine.high %v494_v32, %v526_v33  ;;  %2306 = vmatprep.subr.bf16.mxu1 %v4258_v30  ;;  %v4321_v40 = vcombine.low %v494_v32, %v526_v33  ;;  %v432_v57 = vld [vmem:[%s5262_s27 + $0x10] sm:$0xff]  ;;  %v4618_v59 = vpack.c.bf16 %v321_v56, %v320_v55 }
  0xa4   : > { %4599 = vmatpush3.bf16.msra.mxu0 %v4598_v19  ;;  %2307 = vmatpush1.bf16.msra.mxu1 %v4257_v31  ;;  %v4606_v41 = vpack.c.bf16 %v315_v36, %v314_v35  ;;  %v334_v45 = vld [vmem:[%s6129_s1 + $0xe0] sm:$0xff]  ;;  %v335_v46 = vld [vmem:[%s6129_s1 + $0xe8] sm:$0xff]  ;;  %v464_v58 = vld [vmem:[%s5262_s27 + $0x110] sm:$0xff] }
  0xa5   : > { %4601 = vmatprep.subr.bf16.mxu0 %v4600_v20  ;;  %2308 = vmatprep.subr.bf16.mxu1 %v4322_v37  ;;  %v4612_v48 = vpack.c.bf16 %v335_v46, %v334_v45  ;;  %v318_v49 = vld [vmem:[%s6129_s1 + $0x60] sm:$0xff]  ;;  %v319_v50 = vld [vmem:[%s6129_s1 + $0x68] sm:$0xff]  ;;  %v4262_v60 = vcombine.high %v432_v57, %v464_v58  ;;  %v496_v61 = vld [vmem:[%s5262_s27 + $0x210] sm:$0xff]  ;;  %v4261_v63 = vcombine.low %v432_v57, %v464_v58 }
  0xa6   : > { %v4614_v53 = vpack.c.bf16 %v319_v50, %v318_v49  ;;  %v528_v62 = vld [vmem:[%s5262_s27 + $0x310] sm:$0xff]  ;;  %v558_v2 = vld [vmem:[%s5262_s27 + $0x400] sm:$0xff]  ;;  %v463_v19 = vld [vmem:[%s5262_s27 + $0x108] sm:$0xff] }
  0xa7   : > { %v4326_v0 = vcombine.high %v496_v61, %v528_v62  ;;  %v4325_v1 = vcombine.low %v496_v61, %v528_v62  ;;  %v590_v3 = vld [vmem:[%s5262_s27 + $0x500] sm:$0xff]  ;;  %v560_v4 = vld [vmem:[%s5262_s27 + $0x410] sm:$0xff]  ;;  %v4260_v21 = vcombine.high %v431_v18, %v463_v19  ;;  %v4259_v23 = vcombine.low %v431_v18, %v463_v19  ;;  %v4255_v28 = vld [vmem:[#allocation5] ss:$0 sm:$0xff] }
  0xa8   : > { %4603 = vmatpush3.bf16.msra.mxu0 %v4602_v29  ;;  %2309 = vmatpush1.bf16.msra.mxu1 %v4321_v40  ;;  %v4386_v5 = vcombine.high %v558_v2, %v590_v3  ;;  %v592_v6 = vld [vmem:[%s5262_s27 + $0x510] sm:$0xff]  ;;  %v4385_v9 = vcombine.low %v558_v2, %v590_v3  ;;  %v622_v10 = vld [vmem:[%s5262_s27 + $0x600] sm:$0xff]  ;;  %v495_v32 = vld [vmem:[%s5262_s27 + $0x208] sm:$0xff] }
  0xa9   : > { %4605 = vmatprep.subr.bf16.mxu0 %v4604_v34  ;;  %v4389_v7 = vcombine.low %v560_v4, %v592_v6  ;;  %v4390_v8 = vcombine.high %v560_v4, %v592_v6  ;;  %v654_v11 = vld [vmem:[%s5262_s27 + $0x700] sm:$0xff]  ;;  %v624_v12 = vld [vmem:[%s5262_s27 + $0x610] sm:$0xff]  ;;  %v527_v34 = vld [vmem:[%s5262_s27 + $0x308] sm:$0xff] }
  0xaa   : > { %2310 = vmatprep.subr.bf16.mxu1 %v4386_v5  ;;  %v4450_v13 = vcombine.high %v622_v10, %v654_v11  ;;  %v656_v14 = vld [vmem:[%s5262_s27 + $0x710] sm:$0xff]  ;;  %v4449_v17 = vcombine.low %v622_v10, %v654_v11  ;;  %v434_v20 = vld [vmem:[%s5262_s27 + $0x20] sm:$0xff]  ;;  %v4324_v39 = vcombine.high %v495_v32, %v527_v34  ;;  %v4323_v45 = vcombine.low %v495_v32, %v527_v34  ;;  %v623_v49 = vld [vmem:[%s5262_s27 + $0x608] sm:$0xff] }
  0xab   : > { %v4453_v15 = vcombine.low %v624_v12, %v656_v14  ;;  %v4454_v16 = vcombine.high %v624_v12, %v656_v14  ;;  %v466_v22 = vld [vmem:[%s5262_s27 + $0x120] sm:$0xff]  ;;  %v655_v50 = vld [vmem:[%s5262_s27 + $0x708] sm:$0xff]  ;;  %v433_v57 = vld [vmem:[%s5262_s27 + $0x18] sm:$0xff] }
  0xac   : > { %4607 = vmatpush3.bf16.msra.mxu0 %v4606_v41  ;;  %2311 = vmatpush1.bf16.msra.mxu1 %v4385_v9  ;;  %v4265_v24 = vcombine.low %v434_v20, %v466_v22  ;;  %v498_v35 = vld [vmem:[%s5262_s27 + $0x220] sm:$0xff]  ;;  %v559_v41 = vld [vmem:[%s5262_s27 + $0x408] sm:$0xff]  ;;  %v4452_v55 = vcombine.high %v623_v49, %v655_v50  ;;  %v465_v58 = vld [vmem:[%s5262_s27 + $0x118] sm:$0xff]  ;;  %v4451_v61 = vcombine.low %v623_v49, %v655_v50 }
  0xad   : > { %4609 = vmatprep.subr.bf16.mxu0 %v4608_v42  ;;  %2312 = vmatprep.subr.bf16.mxu1 %v4450_v13  ;;  %v530_v36 = vld [vmem:[%s5262_s27 + $0x320] sm:$0xff]  ;;  %v591_v42 = vld [vmem:[%s5262_s27 + $0x508] sm:$0xff]  ;;  %v529_v2 = vld [vmem:[%s5262_s27 + $0x318] sm:$0xff]  ;;  %v4263_v5 = vcombine.low %v433_v57, %v465_v58 }
  0xae   : > { %v4330_v40 = vcombine.high %v498_v35, %v530_v36  ;;  %v562_v43 = vld [vmem:[%s5262_s27 + $0x420] sm:$0xff]  ;;  %v4329_v46 = vcombine.low %v498_v35, %v530_v36  ;;  %v500_v3 = vld [vmem:[%s5262_s27 + $0x230] sm:$0xff]  ;;  %v561_v9 = vld [vmem:[%s5262_s27 + $0x418] sm:$0xff] }
  0xaf   : > { %v594_v44 = vld [vmem:[%s5262_s27 + $0x520] sm:$0xff]  ;;  %v532_v4 = vld [vmem:[%s5262_s27 + $0x330] sm:$0xff]  ;;  %v593_v10 = vld [vmem:[%s5262_s27 + $0x518] sm:$0xff] }
  0xb0   : > { %4611 = vmatpush3.bf16.msra.mxu0 %v4610_v47  ;;  %2313 = vmatpush1.bf16.msra.mxu1 %v4449_v17  ;;  %v4388_v47 = vcombine.high %v559_v41, %v591_v42  ;;  %v626_v51 = vld [vmem:[%s5262_s27 + $0x620] sm:$0xff]  ;;  %v564_v11 = vld [vmem:[%s5262_s27 + $0x430] sm:$0xff]  ;;  %v4333_v14 = vcombine.low %v500_v3, %v532_v4  ;;  %v625_v17 = vld [vmem:[%s5262_s27 + $0x618] sm:$0xff] }
  0xb1   : > { %4613 = vmatprep.subr.bf16.mxu0 %v4612_v48  ;;  %2347 = vmatprep.subr.bf16.mxu1 %v4260_v21  ;;  %v4394_v48 = vcombine.high %v562_v43, %v594_v44  ;;  %v658_v52 = vld [vmem:[%s5262_s27 + $0x720] sm:$0xff]  ;;  %v596_v12 = vld [vmem:[%s5262_s27 + $0x530] sm:$0xff]  ;;  %v657_v18 = vld [vmem:[%s5262_s27 + $0x718] sm:$0xff]  ;;  %v4391_v21 = vcombine.low %v561_v9, %v593_v10 }
  0xb2   : > { %v4458_v56 = vcombine.high %v626_v51, %v658_v52  ;;  %v4457_v62 = vcombine.low %v626_v51, %v658_v52  ;;  %v628_v19 = vld [vmem:[%s5262_s27 + $0x630] sm:$0xff]  ;;  %v499_v34 = vld [vmem:[%s5262_s27 + $0x228] sm:$0xff]  ;;  %v502_v36 = vld [vmem:[%s5262_s27 + $0x240] sm:$0xff] }
  0xb3   : > { %v531_v35 = vld [vmem:[%s5262_s27 + $0x328] sm:$0xff] }
  0xb4   : > { %4615 = vmatpush3.bf16.msra.mxu0 %v4614_v53  ;;  %v4387_v53 = vcombine.low %v559_v41, %v591_v42  ;;  %v4332_v41 = vcombine.high %v499_v34, %v531_v35  ;;  %v627_v51 = vld [vmem:[%s5262_s27 + $0x628] sm:$0xff] }
  0xb5   : > { %4617 = vmatprep.subr.bf16.mxu0 %v4616_v54  ;;  %v4393_v54 = vcombine.low %v562_v43, %v594_v44  ;;  %v563_v43 = vld [vmem:[%s5262_s27 + $0x428] sm:$0xff] }
  0xb6   : > { %v595_v44 = vld [vmem:[%s5262_s27 + $0x528] sm:$0xff] }
  0xb7   : > { %v4396_v49 = vcombine.high %v563_v43, %v595_v44  ;;  %v659_v52 = vld [vmem:[%s5262_s27 + $0x728] sm:$0xff] }
  0xb8   : > { %4619 = vmatpush3.bf16.msra.mxu0 %v4618_v59  ;;  %v436_v59 = vld [vmem:[%s5262_s27 + $0x30] sm:$0xff] }
  0xb9   : > { %2388 = vmatprep.subr.bf16.mxu0 %v4262_v60  ;;  %v468_v60 = vld [vmem:[%s5262_s27 + $0x130] sm:$0xff] }
  0xba   : > { %v4269_v6 = vcombine.low %v436_v59, %v468_v60 }
  0xbb   : > { %421 = vmatmul.mubr.f32.vlgmr.msra.gmra.mrb[0].mxu0 %v4256_v25  ;;  %v4266_v25 = vcombine.high %v434_v20, %v466_v22  ;;  %v660_v20 = vld [vmem:[%s5262_s27 + $0x730] sm:$0xff]  ;;  %v4397_v22 = vcombine.low %v564_v11, %v596_v12 }
  0xbc   : > { %2389 = vmatpush1.bf16.msra.mxu0 %v4261_v63  ;;  %2420 = vmatprep.mubr.bf16.mxu0 %v5024_v26  ;;  %v4264_v63 = vcombine.high %v433_v57, %v465_v58  ;;  %v4460_v57 = vcombine.high %v627_v51, %v659_v52 }
  0xbd   : > { %2390 = vmatprep.subr.bf16.mxu0 %v4326_v0  ;;  %v4270_v0 = vcombine.high %v436_v59, %v468_v60  ;;  %v437_v59 = vld [vmem:[%s5262_s27 + $0x38] sm:$0xff] }
  0xbe   : > { %v469_v60 = vld [vmem:[%s5262_s27 + $0x138] sm:$0xff] }
  0xc0   : > { %2391 = vmatpush1.bf16.msra.mxu0 %v4325_v1  ;;  %v497_v1 = vld [vmem:[%s5262_s27 + $0x218] sm:$0xff] }
  0xc1   : > { %2392 = vmatprep.subr.bf16.mxu0 %v4390_v8  ;;  %v4334_v8 = vcombine.high %v500_v3, %v532_v4  ;;  %v4327_v13 = vcombine.low %v497_v1, %v529_v2  ;;  %v501_v3 = vld [vmem:[%s5262_s27 + $0x238] sm:$0xff] }
  0xc2   : > { %v533_v4 = vld [vmem:[%s5262_s27 + $0x338] sm:$0xff] }
  0xc4   : > { %2393 = vmatpush1.bf16.msra.mxu0 %v4389_v7  ;;  %v4328_v7 = vcombine.high %v497_v1, %v529_v2  ;;  %v4272_v1 = vcombine.high %v437_v59, %v469_v60 }
  0xc5   : > { %2394 = vmatprep.subr.bf16.mxu0 %v4454_v16  ;;  %v4398_v16 = vcombine.high %v564_v11, %v596_v12  ;;  %v565_v11 = vld [vmem:[%s5262_s27 + $0x438] sm:$0xff] }
  0xc6   : > { %v597_v12 = vld [vmem:[%s5262_s27 + $0x538] sm:$0xff] }
  0xc8   : > { %2395 = vmatpush1.bf16.msra.mxu0 %v4453_v15  ;;  %v4392_v15 = vcombine.high %v561_v9, %v593_v10  ;;  %v4336_v9 = vcombine.high %v501_v3, %v533_v4 }
  0xc9   : > { %2470 = vmatprep.subr.bf16.mxu0 %v4266_v25  ;;  %v435_v25 = vld [vmem:[%s5262_s27 + $0x28] sm:$0xff] }
 0x18e   : > { %v4585_v27 = vpop.f32.mrb[0].mxu0 }
 0x18f   : > { %v4586_v29 = vpop.f32.mrb[1].mxu0 }
 0x190   : > { %v4587_v30 = vadd.f32 %v4586_v29, %v4585_v27  ;;  %v467_v27 = vld [vmem:[%s5262_s27 + $0x128] sm:$0xff]  ;;  %v470_v29 = vld [vmem:[%s5262_s27 + $0x140] sm:$0xff] }
 0x191   : > { %v4268_v32 = vcombine.high %v435_v25, %v467_v27 }
 0x192   : > { %v423_v31 = vadd.f32 %v4587_v30, %v4255_v28  ;;  %v438_v28 = vld [vmem:[%s5262_s27 + $0x40] sm:$0xff]  ;;  %v4455_v30 = vcombine.low %v625_v17, %v657_v18 }
 0x194   : > { %vm426_vm0 = vcmp.gt.f32.partialorder %v423_v31, 0.0  ;;  %v427_v33 = vmul.f32 0.2, %v423_v31 }
 0x196   : > { %v428_v37 = vsel %vm426_vm0, %v423_v31, %v427_v33  ;;  %v4461_v31 = vcombine.low %v628_v19, %v660_v20  ;;  %v4274_v33 = vcombine.high %v438_v28, %v470_v29 }
 0x197   : > { %v5390_v38 = vpack.c.bf16 %v428_v37, %v428_v37  ;;  %v534_v37 = vld [vmem:[%s5262_s27 + $0x340] sm:$0xff] }
 0x198   : > { %v4338_v42 = vcombine.high %v502_v36, %v534_v37 }
 0x199   : > { %4513 = vmatmul.mubr.msk.bf16.vlgmr.msra.gmra.mrb[0].mxu1 %vm2302_vm1, %v5390_v38  ;;  %4515 = vmatmul.mubr.msk.bf16.vlgmr.msra.gmra.mrb[4].mxu0 %vm2302_vm1, %v5390_v38 }
 0x19a   : > { %2348 = vmatpush1.bf16.msra.mxu1 %v4259_v23  ;;  %2471 = vmatpush1.bf16.msra.mxu0 %v4265_v24  ;;  %v4456_v23 = vcombine.high %v625_v17, %v657_v18  ;;  %v4462_v24 = vcombine.high %v628_v19, %v660_v20  ;;  %v4400_v17 = vcombine.high %v565_v11, %v597_v12  ;;  %v629_v19 = vld [vmem:[%s5262_s27 + $0x638] sm:$0xff] }
 0x19b   : > { %2349 = vmatprep.subr.bf16.mxu1 %v4324_v39  ;;  %2472 = vmatprep.subr.bf16.mxu0 %v4330_v40  ;;  %v4267_v39 = vcombine.low %v435_v25, %v467_v27  ;;  %v4273_v40 = vcombine.low %v438_v28, %v470_v29  ;;  %v661_v20 = vld [vmem:[%s5262_s27 + $0x738] sm:$0xff]  ;;  %v439_v28 = vld [vmem:[%s5262_s27 + $0x48] sm:$0xff] }
 0x19c   : > { %2379 = vmatprep.mubr.bf16.mxu1 %v5024_v26  ;;  %2502 = vmatprep.mubr.bf16.mxu0 %v5024_v26  ;;  %v4464_v25 = vcombine.high %v629_v19, %v661_v20  ;;  %v471_v29 = vld [vmem:[%s5262_s27 + $0x148] sm:$0xff] }
 0x19e   : > { %2350 = vmatpush1.bf16.msra.mxu1 %v4323_v45  ;;  %2473 = vmatpush1.bf16.msra.mxu0 %v4329_v46  ;;  %v566_v45 = vld [vmem:[%s5262_s27 + $0x440] sm:$0xff] }
 0x19f   : > { %2351 = vmatprep.subr.bf16.mxu1 %v4388_v47  ;;  %2474 = vmatprep.subr.bf16.mxu0 %v4394_v48  ;;  %v598_v46 = vld [vmem:[%s5262_s27 + $0x540] sm:$0xff]  ;;  %v4331_v47 = vcombine.low %v499_v34, %v531_v35  ;;  %v4337_v48 = vcombine.low %v502_v36, %v534_v37  ;;  %v4276_v34 = vcombine.high %v439_v28, %v471_v29  ;;  %v503_v36 = vld [vmem:[%s5262_s27 + $0x248] sm:$0xff] }
 0x1a0   : > { %v4402_v50 = vcombine.high %v566_v45, %v598_v46  ;;  %v535_v37 = vld [vmem:[%s5262_s27 + $0x348] sm:$0xff] }
 0x1a2   : > { %2352 = vmatpush1.bf16.msra.mxu1 %v4387_v53  ;;  %2475 = vmatpush1.bf16.msra.mxu0 %v4393_v54  ;;  %v630_v53 = vld [vmem:[%s5262_s27 + $0x640] sm:$0xff] }
 0x1a3   : > { %2353 = vmatprep.subr.bf16.mxu1 %v4452_v55  ;;  %2476 = vmatprep.subr.bf16.mxu0 %v4458_v56  ;;  %v662_v54 = vld [vmem:[%s5262_s27 + $0x740] sm:$0xff]  ;;  %v4395_v55 = vcombine.low %v563_v43, %v595_v44  ;;  %v4401_v56 = vcombine.low %v566_v45, %v598_v46  ;;  %v4340_v43 = vcombine.high %v503_v36, %v535_v37  ;;  %v567_v45 = vld [vmem:[%s5262_s27 + $0x448] sm:$0xff] }
 0x1a4   : > { %v4466_v58 = vcombine.high %v630_v53, %v662_v54  ;;  %v599_v46 = vld [vmem:[%s5262_s27 + $0x548] sm:$0xff] }
 0x1a6   : > { %2354 = vmatpush1.bf16.msra.mxu1 %v4451_v61  ;;  %2477 = vmatpush1.bf16.msra.mxu0 %v4457_v62  ;;  %v440_v61 = vld [vmem:[%s5262_s27 + $0x50] sm:$0xff] }
 0x1a7   : > { %2429 = vmatprep.subr.bf16.mxu1 %v4264_v63  ;;  %2552 = vmatprep.subr.bf16.mxu0 %v4270_v0  ;;  %v472_v62 = vld [vmem:[%s5262_s27 + $0x150] sm:$0xff]  ;;  %v4459_v63 = vcombine.low %v627_v51, %v659_v52  ;;  %v4465_v0 = vcombine.low %v630_v53, %v662_v54  ;;  %v4404_v51 = vcombine.high %v567_v45, %v599_v46  ;;  %v631_v53 = vld [vmem:[%s5262_s27 + $0x648] sm:$0xff] }
 0x1a8   : > { %v4278_v2 = vcombine.high %v440_v61, %v472_v62  ;;  %v663_v54 = vld [vmem:[%s5262_s27 + $0x748] sm:$0xff] }
 0x1a9   : > { %4514 = vmatmul.mubr.msk.bf16.vlgmr.msra.gmra.mrb[4].mxu1 %vm2302_vm1, %v5390_v38  ;;  %4517 = vmatmul.mubr.msk.bf16.vlgmr.msra.gmra.mrb[8].mxu0 %vm2302_vm1, %v5390_v38 }
 0x1aa   : > { %2430 = vmatpush1.bf16.msra.mxu1 %v4263_v5  ;;  %2553 = vmatpush1.bf16.msra.mxu0 %v4269_v6  ;;  %v504_v5 = vld [vmem:[%s5262_s27 + $0x250] sm:$0xff] }
 0x1ab   : > { %2431 = vmatprep.subr.bf16.mxu1 %v4328_v7  ;;  %2554 = vmatprep.subr.bf16.mxu0 %v4334_v8  ;;  %v536_v6 = vld [vmem:[%s5262_s27 + $0x350] sm:$0xff]  ;;  %v4271_v7 = vcombine.low %v437_v59, %v469_v60  ;;  %v4277_v8 = vcombine.low %v440_v61, %v472_v62  ;;  %v4468_v59 = vcombine.high %v631_v53, %v663_v54  ;;  %v441_v61 = vld [vmem:[%s5262_s27 + $0x58] sm:$0xff] }
 0x1ac   : > { %2461 = vmatprep.mubr.bf16.mxu1 %v5024_v26  ;;  %2584 = vmatprep.mubr.bf16.mxu0 %v5024_v26  ;;  %v4342_v10 = vcombine.high %v504_v5, %v536_v6  ;;  %v473_v62 = vld [vmem:[%s5262_s27 + $0x158] sm:$0xff] }
 0x1ae   : > { %2432 = vmatpush1.bf16.msra.mxu1 %v4327_v13  ;;  %2555 = vmatpush1.bf16.msra.mxu0 %v4333_v14  ;;  %v568_v13 = vld [vmem:[%s5262_s27 + $0x450] sm:$0xff] }
 0x1af   : > { %2433 = vmatprep.subr.bf16.mxu1 %v4392_v15  ;;  %2556 = vmatprep.subr.bf16.mxu0 %v4398_v16  ;;  %v600_v14 = vld [vmem:[%s5262_s27 + $0x550] sm:$0xff]  ;;  %v4335_v15 = vcombine.low %v501_v3, %v533_v4  ;;  %v4341_v16 = vcombine.low %v504_v5, %v536_v6  ;;  %v4280_v3 = vcombine.high %v441_v61, %v473_v62  ;;  %v505_v5 = vld [vmem:[%s5262_s27 + $0x258] sm:$0xff] }
 0x1b0   : > { %v4406_v18 = vcombine.high %v568_v13, %v600_v14  ;;  %v537_v6 = vld [vmem:[%s5262_s27 + $0x358] sm:$0xff] }
 0x1b2   : > { %2434 = vmatpush1.bf16.msra.mxu1 %v4391_v21  ;;  %2557 = vmatpush1.bf16.msra.mxu0 %v4397_v22  ;;  %v632_v21 = vld [vmem:[%s5262_s27 + $0x650] sm:$0xff] }
 0x1b3   : > { %2435 = vmatprep.subr.bf16.mxu1 %v4456_v23  ;;  %2558 = vmatprep.subr.bf16.mxu0 %v4462_v24  ;;  %v664_v22 = vld [vmem:[%s5262_s27 + $0x750] sm:$0xff]  ;;  %v4399_v23 = vcombine.low %v565_v11, %v597_v12  ;;  %v4405_v24 = vcombine.low %v568_v13, %v600_v14  ;;  %v4344_v11 = vcombine.high %v505_v5, %v537_v6  ;;  %v569_v13 = vld [vmem:[%s5262_s27 + $0x458] sm:$0xff] }
 0x1b4   : > { %v4470_v27 = vcombine.high %v632_v21, %v664_v22  ;;  %v601_v14 = vld [vmem:[%s5262_s27 + $0x558] sm:$0xff] }
 0x1b6   : > { %2436 = vmatpush1.bf16.msra.mxu1 %v4455_v30  ;;  %2559 = vmatpush1.bf16.msra.mxu0 %v4461_v31  ;;  %v442_v30 = vld [vmem:[%s5262_s27 + $0x60] sm:$0xff] }
 0x1b7   : > { %2511 = vmatprep.subr.bf16.mxu1 %v4268_v32  ;;  %2634 = vmatprep.subr.bf16.mxu0 %v4274_v33  ;;  %v474_v31 = vld [vmem:[%s5262_s27 + $0x160] sm:$0xff]  ;;  %v4463_v32 = vcombine.low %v629_v19, %v661_v20  ;;  %v4469_v33 = vcombine.low %v632_v21, %v664_v22  ;;  %v4408_v19 = vcombine.high %v569_v13, %v601_v14  ;;  %v633_v21 = vld [vmem:[%s5262_s27 + $0x658] sm:$0xff] }
 0x1b8   : > { %v4282_v35 = vcombine.high %v442_v30, %v474_v31  ;;  %v665_v22 = vld [vmem:[%s5262_s27 + $0x758] sm:$0xff] }
 0x1b9   : > { %4516 = vmatmul.mubr.msk.bf16.vlgmr.msra.gmra.mrb[8].mxu1 %vm2302_vm1, %v5390_v38  ;;  %4519 = vmatmul.mubr.msk.bf16.vlgmr.msra.gmra.mrb[12].mxu0 %vm2302_vm1, %v5390_v38 }
 0x1ba   : > { %2512 = vmatpush1.bf16.msra.mxu1 %v4267_v39  ;;  %2635 = vmatpush1.bf16.msra.mxu0 %v4273_v40  ;;  %v506_v39 = vld [vmem:[%s5262_s27 + $0x260] sm:$0xff] }
 0x1bb   : > { %2513 = vmatprep.subr.bf16.mxu1 %v4332_v41  ;;  %2636 = vmatprep.subr.bf16.mxu0 %v4338_v42  ;;  %v538_v40 = vld [vmem:[%s5262_s27 + $0x360] sm:$0xff]  ;;  %v4275_v41 = vcombine.low %v439_v28, %v471_v29  ;;  %v4281_v42 = vcombine.low %v442_v30, %v474_v31  ;;  %v4472_v28 = vcombine.high %v633_v21, %v665_v22  ;;  %v443_v30 = vld [vmem:[%s5262_s27 + $0x68] sm:$0xff] }
 0x1bc   : > { %2543 = vmatprep.mubr.bf16.mxu1 %v5024_v26  ;;  %2666 = vmatprep.mubr.bf16.mxu0 %v5024_v26  ;;  %v4346_v44 = vcombine.high %v506_v39, %v538_v40  ;;  %v475_v31 = vld [vmem:[%s5262_s27 + $0x168] sm:$0xff] }
 0x1be   : > { %2514 = vmatpush1.bf16.msra.mxu1 %v4331_v47  ;;  %2637 = vmatpush1.bf16.msra.mxu0 %v4337_v48  ;;  %v570_v47 = vld [vmem:[%s5262_s27 + $0x460] sm:$0xff] }
 0x1bf   : > { %2515 = vmatprep.subr.bf16.mxu1 %v4396_v49  ;;  %2638 = vmatprep.subr.bf16.mxu0 %v4402_v50  ;;  %v602_v48 = vld [vmem:[%s5262_s27 + $0x560] sm:$0xff]  ;;  %v4339_v49 = vcombine.low %v503_v36, %v535_v37  ;;  %v4345_v50 = vcombine.low %v506_v39, %v538_v40  ;;  %v4284_v36 = vcombine.high %v443_v30, %v475_v31  ;;  %v507_v39 = vld [vmem:[%s5262_s27 + $0x268] sm:$0xff] }
 0x1c0   : > { %v4410_v52 = vcombine.high %v570_v47, %v602_v48  ;;  %v539_v40 = vld [vmem:[%s5262_s27 + $0x368] sm:$0xff] }
 0x1c2   : > { %2516 = vmatpush1.bf16.msra.mxu1 %v4395_v55  ;;  %2639 = vmatpush1.bf16.msra.mxu0 %v4401_v56  ;;  %v634_v55 = vld [vmem:[%s5262_s27 + $0x660] sm:$0xff] }
 0x1c3   : > { %2517 = vmatprep.subr.bf16.mxu1 %v4460_v57  ;;  %2640 = vmatprep.subr.bf16.mxu0 %v4466_v58  ;;  %v666_v56 = vld [vmem:[%s5262_s27 + $0x760] sm:$0xff]  ;;  %v4403_v57 = vcombine.low %v567_v45, %v599_v46  ;;  %v4409_v58 = vcombine.low %v570_v47, %v602_v48  ;;  %v4348_v45 = vcombine.high %v507_v39, %v539_v40  ;;  %v571_v47 = vld [vmem:[%s5262_s27 + $0x468] sm:$0xff] }
 0x1c4   : > { %v4474_v60 = vcombine.high %v634_v55, %v666_v56  ;;  %v603_v48 = vld [vmem:[%s5262_s27 + $0x568] sm:$0xff] }
 0x1c6   : > { %2518 = vmatpush1.bf16.msra.mxu1 %v4459_v63  ;;  %2641 = vmatpush1.bf16.msra.mxu0 %v4465_v0  ;;  %v444_v63 = vld [vmem:[%s5262_s27 + $0x70] sm:$0xff] }
 0x1c7   : > { %2593 = vmatprep.subr.bf16.mxu1 %v4272_v1  ;;  %2716 = vmatprep.subr.bf16.mxu0 %v4278_v2  ;;  %v476_v0 = vld [vmem:[%s5262_s27 + $0x170] sm:$0xff]  ;;  %v4467_v1 = vcombine.low %v631_v53, %v663_v54  ;;  %v4473_v2 = vcombine.low %v634_v55, %v666_v56  ;;  %v4412_v53 = vcombine.high %v571_v47, %v603_v48  ;;  %v635_v55 = vld [vmem:[%s5262_s27 + $0x668] sm:$0xff] }
 0x1c8   : > { %v4286_v4 = vcombine.high %v444_v63, %v476_v0  ;;  %v667_v56 = vld [vmem:[%s5262_s27 + $0x768] sm:$0xff] }
 0x1c9   : > { %4518 = vmatmul.mubr.msk.bf16.vlgmr.msra.gmra.mrb[12].mxu1 %vm2302_vm1, %v5390_v38  ;;  %4521 = vmatmul.mubr.msk.bf16.vlgmr.msra.gmra.mrb[16].mxu0 %vm2302_vm1, %v5390_v38 }
 0x1ca   : > { %2594 = vmatpush1.bf16.msra.mxu1 %v4271_v7  ;;  %2717 = vmatpush1.bf16.msra.mxu0 %v4277_v8  ;;  %v508_v7 = vld [vmem:[%s5262_s27 + $0x270] sm:$0xff] }
 0x1cb   : > { %2595 = vmatprep.subr.bf16.mxu1 %v4336_v9  ;;  %2718 = vmatprep.subr.bf16.mxu0 %v4342_v10  ;;  %v540_v8 = vld [vmem:[%s5262_s27 + $0x370] sm:$0xff]  ;;  %v4279_v9 = vcombine.low %v441_v61, %v473_v62  ;;  %v4285_v10 = vcombine.low %v444_v63, %v476_v0  ;;  %v4476_v61 = vcombine.high %v635_v55, %v667_v56  ;;  %v445_v63 = vld [vmem:[%s5262_s27 + $0x78] sm:$0xff] }
 0x1cc   : > { %2625 = vmatprep.mubr.bf16.mxu1 %v5024_v26  ;;  %2748 = vmatprep.mubr.bf16.mxu0 %v5024_v26  ;;  %v4350_v12 = vcombine.high %v508_v7, %v540_v8  ;;  %v477_v0 = vld [vmem:[%s5262_s27 + $0x178] sm:$0xff] }
 0x1ce   : > { %2596 = vmatpush1.bf16.msra.mxu1 %v4335_v15  ;;  %2719 = vmatpush1.bf16.msra.mxu0 %v4341_v16  ;;  %v572_v15 = vld [vmem:[%s5262_s27 + $0x470] sm:$0xff] }
 0x1cf   : > { %2597 = vmatprep.subr.bf16.mxu1 %v4400_v17  ;;  %2720 = vmatprep.subr.bf16.mxu0 %v4406_v18  ;;  %v604_v16 = vld [vmem:[%s5262_s27 + $0x570] sm:$0xff]  ;;  %v4343_v17 = vcombine.low %v505_v5, %v537_v6  ;;  %v4349_v18 = vcombine.low %v508_v7, %v540_v8  ;;  %v4288_v5 = vcombine.high %v445_v63, %v477_v0  ;;  %v509_v7 = vld [vmem:[%s5262_s27 + $0x278] sm:$0xff] }
 0x1d0   : > { %v4414_v20 = vcombine.high %v572_v15, %v604_v16  ;;  %v541_v8 = vld [vmem:[%s5262_s27 + $0x378] sm:$0xff] }
 0x1d2   : > { %2598 = vmatpush1.bf16.msra.mxu1 %v4399_v23  ;;  %2721 = vmatpush1.bf16.msra.mxu0 %v4405_v24  ;;  %v636_v23 = vld [vmem:[%s5262_s27 + $0x670] sm:$0xff] }
 0x1d3   : > { %2599 = vmatprep.subr.bf16.mxu1 %v4464_v25  ;;  %2722 = vmatprep.subr.bf16.mxu0 %v4470_v27  ;;  %v668_v24 = vld [vmem:[%s5262_s27 + $0x770] sm:$0xff]  ;;  %v4407_v25 = vcombine.low %v569_v13, %v601_v14  ;;  %v4413_v27 = vcombine.low %v572_v15, %v604_v16  ;;  %v4352_v13 = vcombine.high %v509_v7, %v541_v8  ;;  %v573_v15 = vld [vmem:[%s5262_s27 + $0x478] sm:$0xff] }
 0x1d4   : > { %v4478_v29 = vcombine.high %v636_v23, %v668_v24  ;;  %v605_v16 = vld [vmem:[%s5262_s27 + $0x578] sm:$0xff] }
 0x1d6   : > { %2600 = vmatpush1.bf16.msra.mxu1 %v4463_v32  ;;  %2723 = vmatpush1.bf16.msra.mxu0 %v4469_v33  ;;  %v446_v32 = vld [vmem:[%s5262_s27 + $0x80] sm:$0xff] }
 0x1d7   : > { %2675 = vmatprep.subr.bf16.mxu1 %v4276_v34  ;;  %2798 = vmatprep.subr.bf16.mxu0 %v4282_v35  ;;  %v478_v33 = vld [vmem:[%s5262_s27 + $0x180] sm:$0xff]  ;;  %v4471_v34 = vcombine.low %v633_v21, %v665_v22  ;;  %v4477_v35 = vcombine.low %v636_v23, %v668_v24  ;;  %v4416_v21 = vcombine.high %v573_v15, %v605_v16  ;;  %v637_v23 = vld [vmem:[%s5262_s27 + $0x678] sm:$0xff] }
 0x1d8   : > { %v4290_v37 = vcombine.high %v446_v32, %v478_v33  ;;  %v669_v24 = vld [vmem:[%s5262_s27 + $0x778] sm:$0xff] }
 0x1d9   : > { %4520 = vmatmul.mubr.msk.bf16.vlgmr.msra.gmra.mrb[16].mxu1 %vm2302_vm1, %v5390_v38  ;;  %4523 = vmatmul.mubr.msk.bf16.vlgmr.msra.gmra.mrb[20].mxu0 %vm2302_vm1, %v5390_v38 }
 0x1da   : > { %2676 = vmatpush1.bf16.msra.mxu1 %v4275_v41  ;;  %2799 = vmatpush1.bf16.msra.mxu0 %v4281_v42  ;;  %v510_v41 = vld [vmem:[%s5262_s27 + $0x280] sm:$0xff] }
 0x1db   : > { %2677 = vmatprep.subr.bf16.mxu1 %v4340_v43  ;;  %2800 = vmatprep.subr.bf16.mxu0 %v4346_v44  ;;  %v542_v42 = vld [vmem:[%s5262_s27 + $0x380] sm:$0xff]  ;;  %v4283_v43 = vcombine.low %v443_v30, %v475_v31  ;;  %v4289_v44 = vcombine.low %v446_v32, %v478_v33  ;;  %v4480_v30 = vcombine.high %v637_v23, %v669_v24  ;;  %v447_v32 = vld [vmem:[%s5262_s27 + $0x88] sm:$0xff] }
 0x1dc   : > { %2707 = vmatprep.mubr.bf16.mxu1 %v5024_v26  ;;  %2830 = vmatprep.mubr.bf16.mxu0 %v5024_v26  ;;  %v4354_v46 = vcombine.high %v510_v41, %v542_v42  ;;  %v479_v33 = vld [vmem:[%s5262_s27 + $0x188] sm:$0xff] }
 0x1de   : > { %2678 = vmatpush1.bf16.msra.mxu1 %v4339_v49  ;;  %2801 = vmatpush1.bf16.msra.mxu0 %v4345_v50  ;;  %v574_v49 = vld [vmem:[%s5262_s27 + $0x480] sm:$0xff] }
 0x1df   : > { %2679 = vmatprep.subr.bf16.mxu1 %v4404_v51  ;;  %2802 = vmatprep.subr.bf16.mxu0 %v4410_v52  ;;  %v606_v50 = vld [vmem:[%s5262_s27 + $0x580] sm:$0xff]  ;;  %v4347_v51 = vcombine.low %v507_v39, %v539_v40  ;;  %v4353_v52 = vcombine.low %v510_v41, %v542_v42  ;;  %v4292_v39 = vcombine.high %v447_v32, %v479_v33  ;;  %v511_v41 = vld [vmem:[%s5262_s27 + $0x288] sm:$0xff] }
 0x1e0   : > { %v4418_v54 = vcombine.high %v574_v49, %v606_v50  ;;  %v543_v42 = vld [vmem:[%s5262_s27 + $0x388] sm:$0xff] }
 0x1e2   : > { %2680 = vmatpush1.bf16.msra.mxu1 %v4403_v57  ;;  %2803 = vmatpush1.bf16.msra.mxu0 %v4409_v58  ;;  %v638_v57 = vld [vmem:[%s5262_s27 + $0x680] sm:$0xff] }
 0x1e3   : > { %2681 = vmatprep.subr.bf16.mxu1 %v4468_v59  ;;  %2804 = vmatprep.subr.bf16.mxu0 %v4474_v60  ;;  %v670_v58 = vld [vmem:[%s5262_s27 + $0x780] sm:$0xff]  ;;  %v4411_v59 = vcombine.low %v571_v47, %v603_v48  ;;  %v4417_v60 = vcombine.low %v574_v49, %v606_v50  ;;  %v4356_v47 = vcombine.high %v511_v41, %v543_v42  ;;  %v575_v49 = vld [vmem:[%s5262_s27 + $0x488] sm:$0xff] }
 0x1e4   : > { %v4482_v62 = vcombine.high %v638_v57, %v670_v58  ;;  %v607_v50 = vld [vmem:[%s5262_s27 + $0x588] sm:$0xff] }
 0x1e6   : > { %2682 = vmatpush1.bf16.msra.mxu1 %v4467_v1  ;;  %2805 = vmatpush1.bf16.msra.mxu0 %v4473_v2  ;;  %v448_v1 = vld [vmem:[%s5262_s27 + $0x90] sm:$0xff] }
 0x1e7   : > { %2757 = vmatprep.subr.bf16.mxu1 %v4280_v3  ;;  %2880 = vmatprep.subr.bf16.mxu0 %v4286_v4  ;;  %v480_v2 = vld [vmem:[%s5262_s27 + $0x190] sm:$0xff]  ;;  %v4475_v3 = vcombine.low %v635_v55, %v667_v56  ;;  %v4481_v4 = vcombine.low %v638_v57, %v670_v58  ;;  %v4420_v55 = vcombine.high %v575_v49, %v607_v50  ;;  %v639_v57 = vld [vmem:[%s5262_s27 + $0x688] sm:$0xff] }
 0x1e8   : > { %v4294_v6 = vcombine.high %v448_v1, %v480_v2  ;;  %v671_v58 = vld [vmem:[%s5262_s27 + $0x788] sm:$0xff] }
 0x1e9   : > { %4522 = vmatmul.mubr.msk.bf16.vlgmr.msra.gmra.mrb[20].mxu1 %vm2302_vm1, %v5390_v38  ;;  %4525 = vmatmul.mubr.msk.bf16.vlgmr.msra.gmra.mrb[24].mxu0 %vm2302_vm1, %v5390_v38 }
 0x1ea   : > { %2758 = vmatpush1.bf16.msra.mxu1 %v4279_v9  ;;  %2881 = vmatpush1.bf16.msra.mxu0 %v4285_v10  ;;  %v512_v9 = vld [vmem:[%s5262_s27 + $0x290] sm:$0xff] }
 0x1eb   : > { %2759 = vmatprep.subr.bf16.mxu1 %v4344_v11  ;;  %2882 = vmatprep.subr.bf16.mxu0 %v4350_v12  ;;  %v544_v10 = vld [vmem:[%s5262_s27 + $0x390] sm:$0xff]  ;;  %v4287_v11 = vcombine.low %v445_v63, %v477_v0  ;;  %v4293_v12 = vcombine.low %v448_v1, %v480_v2  ;;  %v4484_v63 = vcombine.high %v639_v57, %v671_v58  ;;  %v449_v1 = vld [vmem:[%s5262_s27 + $0x98] sm:$0xff] }
 0x1ec   : > { %2789 = vmatprep.mubr.bf16.mxu1 %v5024_v26  ;;  %2912 = vmatprep.mubr.bf16.mxu0 %v5024_v26  ;;  %v4358_v14 = vcombine.high %v512_v9, %v544_v10  ;;  %v481_v2 = vld [vmem:[%s5262_s27 + $0x198] sm:$0xff] }
 0x1ee   : > { %2760 = vmatpush1.bf16.msra.mxu1 %v4343_v17  ;;  %2883 = vmatpush1.bf16.msra.mxu0 %v4349_v18  ;;  %v576_v17 = vld [vmem:[%s5262_s27 + $0x490] sm:$0xff] }
 0x1ef   : > { %2761 = vmatprep.subr.bf16.mxu1 %v4408_v19  ;;  %2884 = vmatprep.subr.bf16.mxu0 %v4414_v20  ;;  %v608_v18 = vld [vmem:[%s5262_s27 + $0x590] sm:$0xff]  ;;  %v4351_v19 = vcombine.low %v509_v7, %v541_v8  ;;  %v4357_v20 = vcombine.low %v512_v9, %v544_v10  ;;  %v4296_v7 = vcombine.high %v449_v1, %v481_v2  ;;  %v513_v9 = vld [vmem:[%s5262_s27 + $0x298] sm:$0xff] }
 0x1f0   : > { %v4422_v22 = vcombine.high %v576_v17, %v608_v18  ;;  %v545_v10 = vld [vmem:[%s5262_s27 + $0x398] sm:$0xff] }
 0x1f2   : > { %2762 = vmatpush1.bf16.msra.mxu1 %v4407_v25  ;;  %2885 = vmatpush1.bf16.msra.mxu0 %v4413_v27  ;;  %v640_v25 = vld [vmem:[%s5262_s27 + $0x690] sm:$0xff] }
 0x1f3   : > { %2763 = vmatprep.subr.bf16.mxu1 %v4472_v28  ;;  %2886 = vmatprep.subr.bf16.mxu0 %v4478_v29  ;;  %v672_v27 = vld [vmem:[%s5262_s27 + $0x790] sm:$0xff]  ;;  %v4415_v28 = vcombine.low %v573_v15, %v605_v16  ;;  %v4421_v29 = vcombine.low %v576_v17, %v608_v18  ;;  %v4360_v15 = vcombine.high %v513_v9, %v545_v10  ;;  %v577_v17 = vld [vmem:[%s5262_s27 + $0x498] sm:$0xff] }
 0x1f4   : > { %v4486_v31 = vcombine.high %v640_v25, %v672_v27  ;;  %v609_v18 = vld [vmem:[%s5262_s27 + $0x598] sm:$0xff] }
 0x1f6   : > { %2764 = vmatpush1.bf16.msra.mxu1 %v4471_v34  ;;  %2887 = vmatpush1.bf16.msra.mxu0 %v4477_v35  ;;  %v450_v34 = vld [vmem:[%s5262_s27 + $0xa0] sm:$0xff] }
 0x1f7   : > { %2839 = vmatprep.subr.bf16.mxu1 %v4284_v36  ;;  %2962 = vmatprep.subr.bf16.mxu0 %v4290_v37  ;;  %v482_v35 = vld [vmem:[%s5262_s27 + $0x1a0] sm:$0xff]  ;;  %v4479_v36 = vcombine.low %v637_v23, %v669_v24  ;;  %v4485_v37 = vcombine.low %v640_v25, %v672_v27  ;;  %v4424_v23 = vcombine.high %v577_v17, %v609_v18  ;;  %v641_v25 = vld [vmem:[%s5262_s27 + $0x698] sm:$0xff] }
 0x1f8   : > { %v4298_v40 = vcombine.high %v450_v34, %v482_v35  ;;  %v673_v27 = vld [vmem:[%s5262_s27 + $0x798] sm:$0xff] }
 0x1f9   : > { %4524 = vmatmul.mubr.msk.bf16.vlgmr.msra.gmra.mrb[24].mxu1 %vm2302_vm1, %v5390_v38  ;;  %4527 = vmatmul.mubr.msk.bf16.vlgmr.msra.gmra.mrb[28].mxu0 %vm2302_vm1, %v5390_v38 }
 0x1fa   : > { %2840 = vmatpush1.bf16.msra.mxu1 %v4283_v43  ;;  %2963 = vmatpush1.bf16.msra.mxu0 %v4289_v44  ;;  %v514_v43 = vld [vmem:[%s5262_s27 + $0x2a0] sm:$0xff] }
 0x1fb   : > { %2841 = vmatprep.subr.bf16.mxu1 %v4348_v45  ;;  %2964 = vmatprep.subr.bf16.mxu0 %v4354_v46  ;;  %v546_v44 = vld [vmem:[%s5262_s27 + $0x3a0] sm:$0xff]  ;;  %v4291_v45 = vcombine.low %v447_v32, %v479_v33  ;;  %v4297_v46 = vcombine.low %v450_v34, %v482_v35  ;;  %v4488_v32 = vcombine.high %v641_v25, %v673_v27  ;;  %v451_v34 = vld [vmem:[%s5262_s27 + $0xa8] sm:$0xff] }
 0x1fc   : > { %2871 = vmatprep.mubr.bf16.mxu1 %v5024_v26  ;;  %2994 = vmatprep.mubr.bf16.mxu0 %v5024_v26  ;;  %v4362_v48 = vcombine.high %v514_v43, %v546_v44  ;;  %v483_v35 = vld [vmem:[%s5262_s27 + $0x1a8] sm:$0xff] }
 0x1fe   : > { %2842 = vmatpush1.bf16.msra.mxu1 %v4347_v51  ;;  %2965 = vmatpush1.bf16.msra.mxu0 %v4353_v52  ;;  %v578_v51 = vld [vmem:[%s5262_s27 + $0x4a0] sm:$0xff] }
 0x1ff   : > { %2843 = vmatprep.subr.bf16.mxu1 %v4412_v53  ;;  %2966 = vmatprep.subr.bf16.mxu0 %v4418_v54  ;;  %v610_v52 = vld [vmem:[%s5262_s27 + $0x5a0] sm:$0xff]  ;;  %v4355_v53 = vcombine.low %v511_v41, %v543_v42  ;;  %v4361_v54 = vcombine.low %v514_v43, %v546_v44  ;;  %v4300_v41 = vcombine.high %v451_v34, %v483_v35  ;;  %v515_v43 = vld [vmem:[%s5262_s27 + $0x2a8] sm:$0xff] }
 0x200   : > { %v4426_v56 = vcombine.high %v578_v51, %v610_v52  ;;  %v547_v44 = vld [vmem:[%s5262_s27 + $0x3a8] sm:$0xff] }
 0x202   : > { %2844 = vmatpush1.bf16.msra.mxu1 %v4411_v59  ;;  %2967 = vmatpush1.bf16.msra.mxu0 %v4417_v60  ;;  %v642_v59 = vld [vmem:[%s5262_s27 + $0x6a0] sm:$0xff] }
 0x203   : > { %2845 = vmatprep.subr.bf16.mxu1 %v4476_v61  ;;  %2968 = vmatprep.subr.bf16.mxu0 %v4482_v62  ;;  %v674_v60 = vld [vmem:[%s5262_s27 + $0x7a0] sm:$0xff]  ;;  %v4419_v61 = vcombine.low %v575_v49, %v607_v50  ;;  %v4425_v62 = vcombine.low %v578_v51, %v610_v52  ;;  %v4364_v49 = vcombine.high %v515_v43, %v547_v44  ;;  %v579_v51 = vld [vmem:[%s5262_s27 + $0x4a8] sm:$0xff] }
 0x204   : > { %v4490_v0 = vcombine.high %v642_v59, %v674_v60  ;;  %v611_v52 = vld [vmem:[%s5262_s27 + $0x5a8] sm:$0xff] }
 0x206   : > { %2846 = vmatpush1.bf16.msra.mxu1 %v4475_v3  ;;  %2969 = vmatpush1.bf16.msra.mxu0 %v4481_v4  ;;  %v452_v3 = vld [vmem:[%s5262_s27 + $0xb0] sm:$0xff] }
 0x207   : > { %2921 = vmatprep.subr.bf16.mxu1 %v4288_v5  ;;  %3044 = vmatprep.subr.bf16.mxu0 %v4294_v6  ;;  %v484_v4 = vld [vmem:[%s5262_s27 + $0x1b0] sm:$0xff]  ;;  %v4483_v5 = vcombine.low %v639_v57, %v671_v58  ;;  %v4489_v6 = vcombine.low %v642_v59, %v674_v60  ;;  %v4428_v57 = vcombine.high %v579_v51, %v611_v52  ;;  %v643_v59 = vld [vmem:[%s5262_s27 + $0x6a8] sm:$0xff] }
 0x208   : > { %v4302_v8 = vcombine.high %v452_v3, %v484_v4  ;;  %v675_v60 = vld [vmem:[%s5262_s27 + $0x7a8] sm:$0xff] }
 0x209   : > { %4526 = vmatmul.mubr.msk.bf16.vlgmr.msra.gmra.mrb[28].mxu1 %vm2302_vm1, %v5390_v38  ;;  %4529 = vmatmul.mubr.msk.bf16.vlgmr.msra.gmra.mrb[32].mxu0 %vm2302_vm1, %v5390_v38 }
 0x20a   : > { %2922 = vmatpush1.bf16.msra.mxu1 %v4287_v11  ;;  %3045 = vmatpush1.bf16.msra.mxu0 %v4293_v12  ;;  %v516_v11 = vld [vmem:[%s5262_s27 + $0x2b0] sm:$0xff] }
 0x20b   : > { %2923 = vmatprep.subr.bf16.mxu1 %v4352_v13  ;;  %3046 = vmatprep.subr.bf16.mxu0 %v4358_v14  ;;  %v548_v12 = vld [vmem:[%s5262_s27 + $0x3b0] sm:$0xff]  ;;  %v4295_v13 = vcombine.low %v449_v1, %v481_v2  ;;  %v4301_v14 = vcombine.low %v452_v3, %v484_v4  ;;  %v4492_v1 = vcombine.high %v643_v59, %v675_v60  ;;  %v453_v3 = vld [vmem:[%s5262_s27 + $0xb8] sm:$0xff] }
 0x20c   : > { %2953 = vmatprep.mubr.bf16.mxu1 %v5024_v26  ;;  %3076 = vmatprep.mubr.bf16.mxu0 %v5024_v26  ;;  %v4366_v16 = vcombine.high %v516_v11, %v548_v12  ;;  %v485_v4 = vld [vmem:[%s5262_s27 + $0x1b8] sm:$0xff] }
 0x20e   : > { %2924 = vmatpush1.bf16.msra.mxu1 %v4351_v19  ;;  %3047 = vmatpush1.bf16.msra.mxu0 %v4357_v20  ;;  %v580_v19 = vld [vmem:[%s5262_s27 + $0x4b0] sm:$0xff] }
 0x20f   : > { %2925 = vmatprep.subr.bf16.mxu1 %v4416_v21  ;;  %3048 = vmatprep.subr.bf16.mxu0 %v4422_v22  ;;  %v612_v20 = vld [vmem:[%s5262_s27 + $0x5b0] sm:$0xff]  ;;  %v4359_v21 = vcombine.low %v513_v9, %v545_v10  ;;  %v4365_v22 = vcombine.low %v516_v11, %v548_v12  ;;  %v4304_v9 = vcombine.high %v453_v3, %v485_v4  ;;  %v517_v11 = vld [vmem:[%s5262_s27 + $0x2b8] sm:$0xff] }
 0x210   : > { %v4430_v24 = vcombine.high %v580_v19, %v612_v20  ;;  %v549_v12 = vld [vmem:[%s5262_s27 + $0x3b8] sm:$0xff] }
 0x212   : > { %2926 = vmatpush1.bf16.msra.mxu1 %v4415_v28  ;;  %3049 = vmatpush1.bf16.msra.mxu0 %v4421_v29  ;;  %v644_v28 = vld [vmem:[%s5262_s27 + $0x6b0] sm:$0xff] }
 0x213   : > { %2927 = vmatprep.subr.bf16.mxu1 %v4480_v30  ;;  %3050 = vmatprep.subr.bf16.mxu0 %v4486_v31  ;;  %v676_v29 = vld [vmem:[%s5262_s27 + $0x7b0] sm:$0xff]  ;;  %v4423_v30 = vcombine.low %v577_v17, %v609_v18  ;;  %v4429_v31 = vcombine.low %v580_v19, %v612_v20  ;;  %v4368_v17 = vcombine.high %v517_v11, %v549_v12  ;;  %v581_v19 = vld [vmem:[%s5262_s27 + $0x4b8] sm:$0xff] }
 0x214   : > { %v4494_v33 = vcombine.high %v644_v28, %v676_v29  ;;  %v613_v20 = vld [vmem:[%s5262_s27 + $0x5b8] sm:$0xff] }
 0x216   : > { %2928 = vmatpush1.bf16.msra.mxu1 %v4479_v36  ;;  %3051 = vmatpush1.bf16.msra.mxu0 %v4485_v37  ;;  %v454_v36 = vld [vmem:[%s5262_s27 + $0xc0] sm:$0xff] }
 0x217   : > { %3003 = vmatprep.subr.bf16.mxu1 %v4292_v39  ;;  %3126 = vmatprep.subr.bf16.mxu0 %v4298_v40  ;;  %v486_v37 = vld [vmem:[%s5262_s27 + $0x1c0] sm:$0xff]  ;;  %v4487_v39 = vcombine.low %v641_v25, %v673_v27  ;;  %v4493_v40 = vcombine.low %v644_v28, %v676_v29  ;;  %v4432_v25 = vcombine.high %v581_v19, %v613_v20  ;;  %v645_v28 = vld [vmem:[%s5262_s27 + $0x6b8] sm:$0xff] }
 0x218   : > { %v4306_v42 = vcombine.high %v454_v36, %v486_v37  ;;  %v677_v29 = vld [vmem:[%s5262_s27 + $0x7b8] sm:$0xff] }
 0x219   : > { %4528 = vmatmul.mubr.msk.bf16.vlgmr.msra.gmra.mrb[32].mxu1 %vm2302_vm1, %v5390_v38  ;;  %4531 = vmatmul.mubr.msk.bf16.vlgmr.msra.gmra.mrb[36].mxu0 %vm2302_vm1, %v5390_v38 }
 0x21a   : > { %3004 = vmatpush1.bf16.msra.mxu1 %v4291_v45  ;;  %3127 = vmatpush1.bf16.msra.mxu0 %v4297_v46  ;;  %v518_v45 = vld [vmem:[%s5262_s27 + $0x2c0] sm:$0xff] }
 0x21b   : > { %3005 = vmatprep.subr.bf16.mxu1 %v4356_v47  ;;  %3128 = vmatprep.subr.bf16.mxu0 %v4362_v48  ;;  %v550_v46 = vld [vmem:[%s5262_s27 + $0x3c0] sm:$0xff]  ;;  %v4299_v47 = vcombine.low %v451_v34, %v483_v35  ;;  %v4305_v48 = vcombine.low %v454_v36, %v486_v37  ;;  %v4496_v34 = vcombine.high %v645_v28, %v677_v29  ;;  %v455_v36 = vld [vmem:[%s5262_s27 + $0xc8] sm:$0xff] }
 0x21c   : > { %3035 = vmatprep.mubr.bf16.mxu1 %v5024_v26  ;;  %3158 = vmatprep.mubr.bf16.mxu0 %v5024_v26  ;;  %v4370_v50 = vcombine.high %v518_v45, %v550_v46  ;;  %v487_v37 = vld [vmem:[%s5262_s27 + $0x1c8] sm:$0xff] }
 0x21e   : > { %3006 = vmatpush1.bf16.msra.mxu1 %v4355_v53  ;;  %3129 = vmatpush1.bf16.msra.mxu0 %v4361_v54  ;;  %v582_v53 = vld [vmem:[%s5262_s27 + $0x4c0] sm:$0xff] }
 0x21f   : > { %3007 = vmatprep.subr.bf16.mxu1 %v4420_v55  ;;  %3130 = vmatprep.subr.bf16.mxu0 %v4426_v56  ;;  %v614_v54 = vld [vmem:[%s5262_s27 + $0x5c0] sm:$0xff]  ;;  %v4363_v55 = vcombine.low %v515_v43, %v547_v44  ;;  %v4369_v56 = vcombine.low %v518_v45, %v550_v46  ;;  %v4308_v43 = vcombine.high %v455_v36, %v487_v37  ;;  %v519_v45 = vld [vmem:[%s5262_s27 + $0x2c8] sm:$0xff] }
 0x220   : > { %v4434_v58 = vcombine.high %v582_v53, %v614_v54  ;;  %v551_v46 = vld [vmem:[%s5262_s27 + $0x3c8] sm:$0xff] }
 0x222   : > { %3008 = vmatpush1.bf16.msra.mxu1 %v4419_v61  ;;  %3131 = vmatpush1.bf16.msra.mxu0 %v4425_v62  ;;  %v646_v61 = vld [vmem:[%s5262_s27 + $0x6c0] sm:$0xff] }
 0x223   : > { %3009 = vmatprep.subr.bf16.mxu1 %v4484_v63  ;;  %3132 = vmatprep.subr.bf16.mxu0 %v4490_v0  ;;  %v678_v62 = vld [vmem:[%s5262_s27 + $0x7c0] sm:$0xff]  ;;  %v4427_v63 = vcombine.low %v579_v51, %v611_v52  ;;  %v4433_v0 = vcombine.low %v582_v53, %v614_v54  ;;  %v4372_v51 = vcombine.high %v519_v45, %v551_v46  ;;  %v583_v53 = vld [vmem:[%s5262_s27 + $0x4c8] sm:$0xff] }
 0x224   : > { %v4498_v2 = vcombine.high %v646_v61, %v678_v62  ;;  %v615_v54 = vld [vmem:[%s5262_s27 + $0x5c8] sm:$0xff] }
 0x226   : > { %3010 = vmatpush1.bf16.msra.mxu1 %v4483_v5  ;;  %3133 = vmatpush1.bf16.msra.mxu0 %v4489_v6  ;;  %v456_v5 = vld [vmem:[%s5262_s27 + $0xd0] sm:$0xff] }
 0x227   : > { %3085 = vmatprep.subr.bf16.mxu1 %v4296_v7  ;;  %3208 = vmatprep.subr.bf16.mxu0 %v4302_v8  ;;  %v488_v6 = vld [vmem:[%s5262_s27 + $0x1d0] sm:$0xff]  ;;  %v4491_v7 = vcombine.low %v643_v59, %v675_v60  ;;  %v4497_v8 = vcombine.low %v646_v61, %v678_v62  ;;  %v4436_v59 = vcombine.high %v583_v53, %v615_v54  ;;  %v647_v61 = vld [vmem:[%s5262_s27 + $0x6c8] sm:$0xff] }
 0x228   : > { %v4310_v10 = vcombine.high %v456_v5, %v488_v6  ;;  %v679_v62 = vld [vmem:[%s5262_s27 + $0x7c8] sm:$0xff] }
 0x229   : > { %4530 = vmatmul.mubr.msk.bf16.vlgmr.msra.gmra.mrb[36].mxu1 %vm2302_vm1, %v5390_v38  ;;  %4533 = vmatmul.mubr.msk.bf16.vlgmr.msra.gmra.mrb[40].mxu0 %vm2302_vm1, %v5390_v38 }
 0x22a   : > { %3086 = vmatpush1.bf16.msra.mxu1 %v4295_v13  ;;  %3209 = vmatpush1.bf16.msra.mxu0 %v4301_v14  ;;  %v520_v13 = vld [vmem:[%s5262_s27 + $0x2d0] sm:$0xff] }
 0x22b   : > { %3087 = vmatprep.subr.bf16.mxu1 %v4360_v15  ;;  %3210 = vmatprep.subr.bf16.mxu0 %v4366_v16  ;;  %v552_v14 = vld [vmem:[%s5262_s27 + $0x3d0] sm:$0xff]  ;;  %v4303_v15 = vcombine.low %v453_v3, %v485_v4  ;;  %v4309_v16 = vcombine.low %v456_v5, %v488_v6  ;;  %v4500_v4 = vcombine.high %v647_v61, %v679_v62  ;;  %v457_v6 = vld [vmem:[%s5262_s27 + $0xd8] sm:$0xff] }
 0x22c   : > { %3117 = vmatprep.mubr.bf16.mxu1 %v5024_v26  ;;  %3240 = vmatprep.mubr.bf16.mxu0 %v5024_v26  ;;  %v4374_v18 = vcombine.high %v520_v13, %v552_v14 }
 0x22e   : > { %3088 = vmatpush1.bf16.msra.mxu1 %v4359_v21  ;;  %3211 = vmatpush1.bf16.msra.mxu0 %v4365_v22  ;;  %v584_v21 = vld [vmem:[%s5262_s27 + $0x4d0] sm:$0xff] }
 0x22f   : > { %3089 = vmatprep.subr.bf16.mxu1 %v4424_v23  ;;  %3212 = vmatprep.subr.bf16.mxu0 %v4430_v24  ;;  %v616_v22 = vld [vmem:[%s5262_s27 + $0x5d0] sm:$0xff]  ;;  %v4367_v23 = vcombine.low %v517_v11, %v549_v12  ;;  %v4373_v24 = vcombine.low %v520_v13, %v552_v14  ;;  %v4499_v11 = vcombine.low %v647_v61, %v679_v62 }
 0x230   : > { %v4438_v27 = vcombine.high %v584_v21, %v616_v22 }
 0x232   : > { %3090 = vmatpush1.bf16.msra.mxu1 %v4423_v30  ;;  %3213 = vmatpush1.bf16.msra.mxu0 %v4429_v31  ;;  %v648_v30 = vld [vmem:[%s5262_s27 + $0x6d0] sm:$0xff] }
 0x233   : > { %3091 = vmatprep.subr.bf16.mxu1 %v4488_v32  ;;  %3214 = vmatprep.subr.bf16.mxu0 %v4494_v33  ;;  %v680_v31 = vld [vmem:[%s5262_s27 + $0x7d0] sm:$0xff]  ;;  %v4431_v32 = vcombine.low %v581_v19, %v613_v20  ;;  %v4437_v33 = vcombine.low %v584_v21, %v616_v22 }
 0x234   : > { %v4502_v35 = vcombine.high %v648_v30, %v680_v31 }
 0x236   : > { %3092 = vmatpush1.bf16.msra.mxu1 %v4487_v39  ;;  %3215 = vmatpush1.bf16.msra.mxu0 %v4493_v40  ;;  %v458_v39 = vld [vmem:[%s5262_s27 + $0xe0] sm:$0xff] }
 0x237   : > { %3167 = vmatprep.subr.bf16.mxu1 %v4300_v41  ;;  %3290 = vmatprep.subr.bf16.mxu0 %v4306_v42  ;;  %v490_v40 = vld [vmem:[%s5262_s27 + $0x1e0] sm:$0xff]  ;;  %v4495_v41 = vcombine.low %v645_v28, %v677_v29  ;;  %v4501_v42 = vcombine.low %v648_v30, %v680_v31  ;;  %v585_v29 = vld [vmem:[%s5262_s27 + $0x4d8] sm:$0xff]  ;;  %v588_v31 = vld [vmem:[%s5262_s27 + $0x4f0] sm:$0xff] }
 0x238   : > { %v4314_v44 = vcombine.high %v458_v39, %v490_v40  ;;  %v617_v30 = vld [vmem:[%s5262_s27 + $0x5d8] sm:$0xff] }
 0x239   : > { %4532 = vmatmul.mubr.msk.bf16.vlgmr.msra.gmra.mrb[40].mxu1 %vm2302_vm1, %v5390_v38  ;;  %4535 = vmatmul.mubr.msk.bf16.vlgmr.msra.gmra.mrb[44].mxu0 %vm2302_vm1, %v5390_v38 }
 0x23a   : > { %3168 = vmatpush1.bf16.msra.mxu1 %v4299_v47  ;;  %3291 = vmatpush1.bf16.msra.mxu0 %v4305_v48  ;;  %v522_v47 = vld [vmem:[%s5262_s27 + $0x2e0] sm:$0xff] }
 0x23b   : > { %3169 = vmatprep.subr.bf16.mxu1 %v4364_v49  ;;  %3292 = vmatprep.subr.bf16.mxu0 %v4370_v50  ;;  %v554_v48 = vld [vmem:[%s5262_s27 + $0x3e0] sm:$0xff]  ;;  %v4307_v49 = vcombine.low %v455_v36, %v487_v37  ;;  %v4313_v50 = vcombine.low %v458_v39, %v490_v40  ;;  %v4440_v40 = vcombine.high %v585_v29, %v617_v30 }
 0x23c   : > { %3199 = vmatprep.mubr.bf16.mxu1 %v5024_v26  ;;  %3322 = vmatprep.mubr.bf16.mxu0 %v5024_v26  ;;  %v4378_v52 = vcombine.high %v522_v47, %v554_v48 }
 0x23e   : > { %3170 = vmatpush1.bf16.msra.mxu1 %v4363_v55  ;;  %3293 = vmatpush1.bf16.msra.mxu0 %v4369_v56  ;;  %v586_v55 = vld [vmem:[%s5262_s27 + $0x4e0] sm:$0xff] }
 0x23f   : > { %3171 = vmatprep.subr.bf16.mxu1 %v4428_v57  ;;  %3294 = vmatprep.subr.bf16.mxu0 %v4434_v58  ;;  %v618_v56 = vld [vmem:[%s5262_s27 + $0x5e0] sm:$0xff]  ;;  %v4371_v57 = vcombine.low %v519_v45, %v551_v46  ;;  %v4377_v58 = vcombine.low %v522_v47, %v554_v48  ;;  %v681_v45 = vld [vmem:[%s5262_s27 + $0x7d8] sm:$0xff]  ;;  %v652_v46 = vld [vmem:[%s5262_s27 + $0x6f0] sm:$0xff] }
 0x240   : > { %v4442_v60 = vcombine.high %v586_v55, %v618_v56  ;;  %v4441_v3 = vcombine.low %v586_v55, %v618_v56  ;;  %v684_v47 = vld [vmem:[%s5262_s27 + $0x7f0] sm:$0xff] }
 0x242   : > { %3172 = vmatpush1.bf16.msra.mxu1 %v4427_v63  ;;  %3295 = vmatpush1.bf16.msra.mxu0 %v4433_v0  ;;  %v650_v63 = vld [vmem:[%s5262_s27 + $0x6e0] sm:$0xff] }
 0x243   : > { %3173 = vmatprep.subr.bf16.mxu1 %v4492_v1  ;;  %3296 = vmatprep.subr.bf16.mxu0 %v4498_v2  ;;  %v682_v0 = vld [vmem:[%s5262_s27 + $0x7e0] sm:$0xff]  ;;  %v702_v1 = vlaneseq  ;;  %v4435_v2 = vcombine.low %v583_v53, %v615_v54 }
 0x244   : > { %v4506_v5 = vcombine.high %v650_v63, %v682_v0  ;;  %v4505_v12 = vcombine.low %v650_v63, %v682_v0  ;;  %v4510_v63 = vcombine.high %v652_v46, %v684_v47 }
 0x246   : > { %3174 = vmatpush1.bf16.msra.mxu1 %v4491_v7  ;;  %3297 = vmatpush1.bf16.msra.mxu0 %v4497_v8  ;;  %v489_v7 = vld [vmem:[%s5262_s27 + $0x1d8] sm:$0xff]  ;;  %v460_v8 = vld [vmem:[%s5262_s27 + $0xf0] sm:$0xff] }
 0x247   : > { %3249 = vmatprep.subr.bf16.mxu1 %v4304_v9  ;;  %3372 = vmatprep.subr.bf16.mxu0 %v4310_v10  ;;  %v492_v9 = vld [vmem:[%s5262_s27 + $0x1f0] sm:$0xff]  ;;  %v5675_v10 = vshrl.u32 %v702_v1, 7  ;;  %v4312_v13 = vcombine.high %v457_v6, %v489_v7  ;;  %v4311_v21 = vcombine.low %v457_v6, %v489_v7  ;;  %v523_v7 = vld [vmem:[%s5262_s27 + $0x2e8] sm:$0xff] }
 0x248   : > { %v4318_v14 = vcombine.high %v460_v8, %v492_v9  ;;  %v4317_v22 = vcombine.low %v460_v8, %v492_v9  ;;  %v555_v8 = vld [vmem:[%s5262_s27 + $0x3e8] sm:$0xff] }
 0x249   : > { %4534 = vmatmul.mubr.msk.bf16.vlgmr.msra.gmra.mrb[44].mxu1 %vm2302_vm1, %v5390_v38  ;;  %4537 = vmatmul.mubr.msk.bf16.vlgmr.msra.gmra.mrb[48].mxu0 %vm2302_vm1, %v5390_v38  ;;  %v5682_v19 = vsub.s32 0, %v5675_v10  ;;  %v5685_v20 = vsub.s32 4, %v5675_v10  ;;  %v5725_v9 = vsub.s32 2, %v5675_v10 }
 0x24a   : > { %3250 = vmatpush1.bf16.msra.mxu1 %v4303_v15  ;;  %3373 = vmatpush1.bf16.msra.mxu0 %v4309_v16  ;;  %v521_v15 = vld [vmem:[%s5262_s27 + $0x2d8] sm:$0xff] }
 0x24b   : > { %3251 = vmatprep.subr.bf16.mxu1 %v4368_v17  ;;  %3374 = vmatprep.subr.bf16.mxu0 %v4374_v18  ;;  %v553_v16 = vld [vmem:[%s5262_s27 + $0x3d8] sm:$0xff]  ;;  %v524_v17 = vld [vmem:[%s5262_s27 + $0x2f0] sm:$0xff] }
 0x24c   : > { %3281 = vmatprep.mubr.bf16.mxu1 %v5024_v26  ;;  %3404 = vmatprep.mubr.bf16.mxu0 %v5024_v26  ;;  %v556_v18 = vld [vmem:[%s5262_s27 + $0x3f0] sm:$0xff] }
 0x24d   : > { %v4382_v28 = vcombine.high %v524_v17, %v556_v18  ;;  %v4381_v36 = vcombine.low %v524_v17, %v556_v18 }
 0x24e   : > { %3252 = vmatpush1.bf16.msra.mxu1 %v4367_v23  ;;  %3375 = vmatpush1.bf16.msra.mxu0 %v4373_v24  ;;  %v5690_v23 = vld [vmem:[%s5687_s26] sm:$0xff]  ;;  %v5693_v24 = vsub.s32 1, %v5675_v10 }
 0x24f   : > { %3253 = vmatprep.subr.bf16.mxu1 %v4432_v25  ;;  %3376 = vmatprep.subr.bf16.mxu0 %v4438_v27  ;;  %v5696_v25 = vsub.s32 5, %v5675_v10  ;;  %v4376_v27 = vcombine.high %v521_v15, %v553_v16  ;;  %v713_v17 = vrot.slane %v5690_v23, %v5725_v9 }
 0x250   : > { %v709_v37 = vrot.slane %v5690_v23, %v5693_v24 }
 0x251   : > { %v725_v39 = vrot.slane %v5690_v23, %v5696_v25 }
 0x252   : > { %3254 = vmatpush1.bf16.msra.mxu1 %v4431_v32  ;;  %3377 = vmatpush1.bf16.msra.mxu0 %v4437_v33  ;;  %v620_v32 = vld [vmem:[%s5262_s27 + $0x5f0] sm:$0xff]  ;;  %v705_v33 = vrot.slane %v5690_v23, %v5682_v19 }
 0x253   : > { %3255 = vmatprep.subr.bf16.mxu1 %v4496_v34  ;;  %3378 = vmatprep.subr.bf16.mxu0 %v4502_v35  ;;  %v721_v34 = vrot.slane %v5690_v23, %v5685_v20  ;;  %v4375_v35 = vcombine.low %v521_v15, %v553_v16  ;;  %v587_v15 = vld [vmem:[%s5262_s27 + $0x4e8] sm:$0xff] }
 0x254   : > { %v619_v16 = vld [vmem:[%s5262_s27 + $0x5e8] sm:$0xff] }
 0x256   : > { %3256 = vmatpush1.bf16.msra.mxu1 %v4495_v41  ;;  %3379 = vmatpush1.bf16.msra.mxu0 %v4501_v42  ;;  %v4446_v41 = vcombine.high %v588_v31, %v620_v32  ;;  %v649_v42 = vld [vmem:[%s5262_s27 + $0x6d8] sm:$0xff] }
 0x257   : > { %3331 = vmatprep.subr.bf16.mxu1 %v4308_v43  ;;  %3454 = vmatprep.subr.bf16.mxu0 %v4314_v44  ;;  %v4504_v62 = vcombine.high %v649_v42, %v681_v45 }
 0x259   : > { %4536 = vmatmul.mubr.msk.bf16.vlgmr.msra.gmra.mrb[48].mxu1 %vm2302_vm1, %v5390_v38  ;;  %4539 = vmatmul.mubr.msk.bf16.vlgmr.msra.gmra.mrb[52].mxu0 %vm2302_vm1, %v5390_v38 }
 0x25a   : > { %3332 = vmatpush1.bf16.msra.mxu1 %v4307_v49  ;;  %3455 = vmatpush1.bf16.msra.mxu0 %v4313_v50 }
 0x25b   : > { %3333 = vmatprep.subr.bf16.mxu1 %v4372_v51  ;;  %3456 = vmatprep.subr.bf16.mxu0 %v4378_v52  ;;  %v4439_v52 = vcombine.low %v585_v29, %v617_v30  ;;  %v4444_v29 = vcombine.high %v587_v15, %v619_v16 }
 0x25c   : > { %3363 = vmatprep.mubr.bf16.mxu1 %v5024_v26  ;;  %3486 = vmatprep.mubr.bf16.mxu0 %v5024_v26 }
 0x25e   : > { %3334 = vmatpush1.bf16.msra.mxu1 %v4371_v57  ;;  %3457 = vmatpush1.bf16.msra.mxu0 %v4377_v58  ;;  %v4445_v57 = vcombine.low %v588_v31, %v620_v32 }
 0x25f   : > { %3335 = vmatprep.subr.bf16.mxu1 %v4436_v59  ;;  %3458 = vmatprep.subr.bf16.mxu0 %v4442_v60 }
 0x262   : > { %3336 = vmatpush1.bf16.msra.mxu1 %v4435_v2  ;;  %3459 = vmatpush1.bf16.msra.mxu0 %v4441_v3  ;;  %v459_v2 = vld [vmem:[%s5262_s27 + $0xe8] sm:$0xff] }
 0x263   : > { %3337 = vmatprep.subr.bf16.mxu1 %v4500_v4  ;;  %3460 = vmatprep.subr.bf16.mxu0 %v4506_v5  ;;  %v491_v3 = vld [vmem:[%s5262_s27 + $0x1e8] sm:$0xff]  ;;  %v4503_v4 = vcombine.low %v649_v42, %v681_v45  ;;  %v4509_v5 = vcombine.low %v652_v46, %v684_v47  ;;  %v4443_v47 = vcombine.low %v587_v15, %v619_v16 }
 0x264   : > { %v4316_v6 = vcombine.high %v459_v2, %v491_v3 }
 0x266   : > { %3338 = vmatpush1.bf16.msra.mxu1 %v4499_v11  ;;  %3461 = vmatpush1.bf16.msra.mxu0 %v4505_v12  ;;  %v4315_v11 = vcombine.low %v459_v2, %v491_v3  ;;  %v5728_v12 = vld [vmem:[%s5687_s26 + $0x8] sm:$0xff]  ;;  %v5770_v2 = vsub.s32 7, %v5675_v10 }
 0x267   : > { %3413 = vmatprep.subr.bf16.mxu1 %v4312_v13  ;;  %3536 = vmatprep.subr.bf16.mxu0 %v4318_v14  ;;  %v5731_v13 = vsub.s32 3, %v5675_v10  ;;  %v4380_v14 = vcombine.high %v523_v7, %v555_v8  ;;  %v737_v18 = vrot.slane %v5728_v12, %v5682_v19 }
 0x269   : > { %4538 = vmatmul.mubr.msk.bf16.vlgmr.msra.gmra.mrb[52].mxu1 %vm2302_vm1, %v5390_v38  ;;  %4541 = vmatmul.mubr.msk.bf16.vlgmr.msra.gmra.mrb[56].mxu0 %vm2302_vm1, %v5390_v38 }
 0x26a   : > { %3414 = vmatpush1.bf16.msra.mxu1 %v4311_v21  ;;  %3537 = vmatpush1.bf16.msra.mxu0 %v4317_v22  ;;  %v717_v21 = vrot.slane %v5690_v23, %v5731_v13  ;;  %v741_v22 = vrot.slane %v5728_v12, %v5693_v24 }
 0x26b   : > { %3415 = vmatprep.subr.bf16.mxu1 %v4376_v27  ;;  %3538 = vmatprep.subr.bf16.mxu0 %v4382_v28  ;;  %v4379_v27 = vcombine.low %v523_v7, %v555_v8  ;;  %v753_v8 = vrot.slane %v5728_v12, %v5685_v20 }
 0x26c   : > { %v2340_v43 = vpop.f32.mrb[0].mxu1  ;;  %v2422_v44 = vpop.f32.mrb[4].mxu0  ;;  %3445 = vmatprep.mubr.bf16.mxu1 %v5024_v26  ;;  %3568 = vmatprep.mubr.bf16.mxu0 %v5024_v26 }
 0x26d   : > { %v2341_v48 = vadd.f32 %v2340_v43, %v705_v33  ;;  %v2423_v49 = vadd.f32 %v2422_v44, %v721_v34  ;;  %v2342_v50 = vpop.f32.mrb[1].mxu1  ;;  %v2424_v51 = vpop.f32.mrb[5].mxu0  ;;  %v651_v33 = vld [vmem:[%s5262_s27 + $0x6e8] sm:$0xff] }
 0x26e   : > { %v2343_v53 = vadd.f32 %v2342_v50, %v709_v37  ;;  %v2425_v54 = vadd.f32 %v2424_v51, %v725_v39  ;;  %3416 = vmatpush1.bf16.msra.mxu1 %v4375_v35  ;;  %3539 = vmatpush1.bf16.msra.mxu0 %v4381_v36  ;;  %v2344_v55 = vpop.f32.mrb[2].mxu1  ;;  %v2426_v56 = vpop.f32.mrb[6].mxu0  ;;  %v683_v34 = vld [vmem:[%s5262_s27 + $0x7e8] sm:$0xff] }
 0x26f   : > { %v3618_v58 = vmul.f32 1.442695, %v2341_v48  ;;  %v3626_v59 = vmul.f32 1.442695, %v2423_v49  ;;  %v2345_v60 = vpop.f32.mrb[3].mxu1  ;;  %v2427_v61 = vpop.f32.mrb[7].mxu0  ;;  %3417 = vmatprep.subr.bf16.mxu1 %v4440_v40  ;;  %3540 = vmatprep.subr.bf16.mxu0 %v4446_v41 }
 0x270   : > { %v3620_v0 = vmul.f32 1.442695, %v2343_v53  ;;  %v3628_v1 = vmul.f32 1.442695, %v2425_v54  ;;  %v4508_v53 = vcombine.high %v651_v33, %v683_v34  ;;  %v461_v56 = vld [vmem:[%s5262_s27 + $0xf8] sm:$0xff] }
 0x271   : > { %4697 = vpow2.f32 %v3618_v58  ;;  %v4507_v58 = vcombine.low %v651_v33, %v683_v34  ;;  %v5025_v60 = vmov 1983009808  }
 0x272   : > { %4699 = vpow2.f32 %v3626_v59  ;;  %3418 = vmatpush1.bf16.msra.mxu1 %v4439_v52  ;;  %3541 = vmatpush1.bf16.msra.mxu0 %v4445_v57  ;;  %v493_v57 = vld [vmem:[%s5262_s27 + $0x1f8] sm:$0xff]  ;;  %v3813_v61 = vunpack.c.l.s4 %v5025_v60 }
 0x273   : > { %4701 = vpow2.f32 %v3620_v0  ;;  %3419 = vmatprep.subr.bf16.mxu1 %v4504_v62  ;;  %3542 = vmatprep.subr.bf16.mxu0 %v4510_v63  ;;  %v4320_v59 = vcombine.high %v461_v56, %v493_v57  ;;  %v525_v62 = vld [vmem:[%s5262_s27 + $0x2f8] sm:$0xff]  ;;  %v5767_v0 = vsub.s32 6, %v5675_v10 }
 0x274   : > { %4703 = vpow2.f32 %v3628_v1  ;;  %v557_v63 = vld [vmem:[%s5262_s27 + $0x3f8] sm:$0xff]  ;;  %v4319_v1 = vcombine.low %v461_v56, %v493_v57 }
 0x275   : > { %v4384_v3 = vcombine.high %v525_v62, %v557_v63  ;;  %v729_v7 = vrot.slane %v5690_v23, %v5767_v0  ;;  %v4383_v15 = vcombine.low %v525_v62, %v557_v63 }
 0x276   : > { %3420 = vmatpush1.bf16.msra.mxu1 %v4503_v4  ;;  %3543 = vmatpush1.bf16.msra.mxu0 %v4509_v5  ;;  %v3814_v4 = vunpack.c.0.s8 %v3813_v61  ;;  %v589_v5 = vld [vmem:[%s5262_s27 + $0x4f8] sm:$0xff] }
 0x277   : > { %3495 = vmatprep.subr.bf16.mxu1 %v4316_v6  ;;  %v621_v6 = vld [vmem:[%s5262_s27 + $0x5f8] sm:$0xff] }
 0x279   : > { %4540 = vmatmul.mubr.msk.bf16.vlgmr.msra.gmra.mrb[56].mxu1 %vm2302_vm1, %v5390_v38  ;;  %4543 = vmatmul.mubr.msk.bf16.vlgmr.msra.gmra.mrb[60].mxu0 %vm2302_vm1, %v5390_v38 }
 0x27a   : > { %3496 = vmatpush1.bf16.msra.mxu1 %v4315_v11  ;;  %3527 = vmatprep.mubr.bf16.mxu1 %v5024_v26  ;;  %v733_v11 = vrot.slane %v5690_v23, %v5770_v2 }
 0x27b   : > { %v5748_v28 = vpop.eup %4697  ;;  %3497 = vmatprep.subr.bf16.mxu1 %v4380_v14  ;;  %v757_v14 = vrot.slane %v5728_v12, %v5696_v25 }
 0x27c   : > { %v5750_v30 = vpop.eup %4699  ;;  %v2381_v31 = vpop.f32.mrb[4].mxu1 }
 0x27d   : > { %v2504_v32 = vpop.f32.mrb[8].mxu0  ;;  %v5754_v35 = vpop.eup %4701  ;;  %v2382_v36 = vadd.f32 %v2381_v31, %v713_v17  ;;  %v4448_v17 = vcombine.high %v589_v5, %v621_v6  ;;  %v685_v31 = vld [vmem:[%s5262_s27 + $0x7f8] sm:$0xff] }
 0x27e   : > { %v2505_v37 = vadd.f32 %v2504_v32, %v737_v18  ;;  %v2383_v39 = vpop.f32.mrb[5].mxu1  ;;  %v2506_v40 = vpop.f32.mrb[9].mxu0  ;;  %v3810_v42 = vcombine.low %v5748_v28, %v5754_v35  ;;  %3498 = vmatpush1.bf16.msra.mxu1 %v4379_v27  ;;  %v5806_v28 = vld [vmem:[%s5687_s26 + $0x10] sm:$0xff]  ;;  %v745_v35 = vrot.slane %v5728_v12, %v5725_v9 }
 0x27f   : > { %v5756_v41 = vpop.eup %4703  ;;  %v2384_v43 = vadd.f32 %v2383_v39, %v717_v21  ;;  %v2507_v44 = vadd.f32 %v2506_v40, %v741_v22  ;;  %v2385_v45 = vpop.f32.mrb[6].mxu1  ;;  %v3622_v49 = vmul.f32 1.442695, %v2382_v36  ;;  %3499 = vmatprep.subr.bf16.mxu1 %v4444_v29  ;;  %v5788_v21 = vsub.s32 %v3814_v4, %v5675_v10  ;;  %v653_v29 = vld [vmem:[%s5262_s27 + $0x6f8] sm:$0xff]  ;;  %s5802_s27 = scalar_lea.vmem [#allocation9], %s4254_s29 }
 0x280   : > { %v2508_v46 = vpop.f32.mrb[10].mxu0  ;;  %v3827_v48 = vcombine.low %v5750_v30, %v5756_v41  ;;  %v3634_v50 = vmul.f32 1.442695, %v2505_v37  ;;  %v2386_v51 = vpop.f32.mrb[7].mxu1  ;;  %v4447_v10 = vcombine.low %v589_v5, %v621_v6  ;;  %v4511_v57 = vcombine.low %v653_v29, %v685_v31  ;;  %s4129_s11 = sshll.u32 %s5802_s27, 4  ;;  %s6085_s11 = int_to_ptr.vmem [resolvable:$true] %s4129_s11 }
 0x281   : > { %v2509_v52 = vpop.f32.mrb[11].mxu0  ;;  %v3624_v54 = vmul.f32 1.442695, %v2384_v43  ;;  %v3636_v55 = vmul.f32 1.442695, %v2507_v44  ;;  %4705 = vpow2.f32 %v3622_v49  ;;  %v4512_v51 = vcombine.high %v653_v29, %v685_v31  ;;  %s4941_s12 = scalar_lea.vmem %s6085_s11, 2048  ;;  %p4948_p9 = scmp.lt.s32.totalorder %s6085_s11, %s4946_s7 }
 0x282   : > { %4707 = vpow2.f32 %v3634_v50  ;;  %3500 = vmatpush1.bf16.msra.mxu1 %v4443_v47  ;;  %v3818_v52 = vrot.slane %v3810_v42, %v5788_v21  ;;  %v769_v42 = vrot.slane %v5806_v28, %v5682_v19  ;;  %v3835_v31 = vrot.slane %v3827_v48, %v5788_v21  ;;  %p4942_p8 = scmp.ne.s32.totalorder %s6085_s11, %s4941_s12  ;;  %p4949_p2 = scmp.lt.s32.totalorder %s4947_s24, %s4941_s12 }
 0x283   : > { %4709 = vpow2.f32 %v3624_v54  ;;  %3501 = vmatprep.subr.bf16.mxu1 %v4508_v53  ;;  %v765_v30 = vrot.slane %v5728_v12, %v5770_v2  ;;  %v789_v41 = vrot.slane %v5806_v28, %v5696_v25 }
 0x284   : > { %4711 = vpow2.f32 %v3636_v55  ;;  %p4943_p1 = pnand %p4942_p8, %p6174_p10  ;;  %p4950_p5 = por %p4949_p2, %p4948_p9 }
 0x286   : > { %3502 = vmatpush1.bf16.msra.mxu1 %v4507_v58  ;;  %v749_v58 = vrot.slane %v5728_v12, %v5731_v13  ;;  %p4944_p11 = pneg %p4943_p1 }
 0x287   : > { %3577 = vmatprep.subr.bf16.mxu1 %v4320_v59  ;;  %v773_v59 = vrot.slane %v5806_v28, %v5693_v24 }
 0x288   : > { %p4951_p7 = pnand %p4950_p5, %p4944_p11 }
 0x289   : > { %4542 = vmatmul.mubr.msk.bf16.vlgmr.msra.gmra.mrb[60].mxu1 %vm2302_vm1, %v5390_v38 }
 0x28a   : > { %3578 = vmatpush1.bf16.msra.mxu1 %v4319_v1  ;;  %3609 = vmatprep.mubr.bf16.mxu1 %v5024_v26 }
 0x28b   : > { %v4706_v16 = vpop.eup %4705  ;;  %3579 = vmatprep.subr.bf16.mxu1 %v4384_v3 }
 0x28c   : > { %v5785_v18 = vpop.eup %4707  ;;  %v2463_v22 = vpop.f32.mrb[8].mxu1 }
 0x28d   : > { %v2586_v27 = vpop.f32.mrb[12].mxu0  ;;  %v4710_v23 = vpop.eup %4709  ;;  %v2464_v32 = vadd.f32 %v2463_v22, %v729_v7 }
 0x28e   : > { %v2587_v33 = vadd.f32 %v2586_v27, %v753_v8  ;;  %v2465_v34 = vpop.f32.mrb[9].mxu1  ;;  %v2588_v36 = vpop.f32.mrb[13].mxu0  ;;  %v3811_v26 = vcombine.low %v4706_v16, %v4710_v23  ;;  %3580 = vmatpush1.bf16.msra.mxu1 %v4383_v15 }
 0x28f   : > { %v5792_v37 = vpop.eup %4711  ;;  %v2466_v39 = vadd.f32 %v2465_v34, %v733_v11  ;;  %v2589_v40 = vadd.f32 %v2588_v36, %v757_v14  ;;  %v2467_v43 = vpop.f32.mrb[10].mxu1  ;;  %v3630_v46 = vmul.f32 1.442695, %v2464_v32  ;;  %3581 = vmatprep.subr.bf16.mxu1 %v4448_v17  ;;  %v761_v36 = vrot.slane %v5728_v12, %v5767_v0 }
 0x290   : > { %v2590_v44 = vpop.f32.mrb[14].mxu0  ;;  %v3844_v45 = vcombine.low %v5785_v18, %v5792_v37  ;;  %v3642_v47 = vmul.f32 1.442695, %v2587_v33  ;;  %v2468_v49 = vpop.f32.mrb[11].mxu1  ;;  %v3825_v53 = vrot.slane %v3811_v26, %v5788_v21  ;;  %v785_v26 = vrot.slane %v5806_v28, %v5685_v20 }
 0x291   : > { %v2591_v50 = vpop.f32.mrb[15].mxu0  ;;  %v3632_v54 = vmul.f32 1.442695, %v2466_v39  ;;  %v3644_v55 = vmul.f32 1.442695, %v2589_v40  ;;  %4713 = vpow2.f32 %v3630_v46  ;;  %v781_v18 = vrot.slane %v5806_v28, %v5731_v13 }
 0x292   : > { %v3826_v56 = vcombine.low %v3818_v52, %v3825_v53  ;;  %4715 = vpow2.f32 %v3642_v47  ;;  %3582 = vmatpush1.bf16.msra.mxu1 %v4447_v10 }
 0x293   : > { %4717 = vpow2.f32 %v3632_v54  ;;  %3583 = vmatprep.subr.bf16.mxu1 %v4512_v51 }
 0x294   : > { %4098 = vst [vmem:[%s5802_s27] sm:$0xff] %v3826_v56  ;;  %4719 = vpow2.f32 %v3644_v55 }
 0x296   : > { %3584 = vmatpush1.bf16.msra.mxu1 %v4511_v57 }
 0x299   : > { %4544 = vmatmul.mubr.msk.bf16.vlgmr.msra.gmra.mrb[64].mxu1 %vm2302_vm1, %v5390_v38 }
 0x29b   : > { %v4714_v60 = vpop.eup %4713 }
 0x29c   : > { %v5818_v61 = vpop.eup %4715  ;;  %v2545_v62 = vpop.f32.mrb[12].mxu1 }
 0x29d   : > { %v2668_v63 = vpop.f32.mrb[16].mxu0  ;;  %v4718_v1 = vpop.eup %4717  ;;  %v2546_v3 = vadd.f32 %v2545_v62, %v745_v35 }
 0x29e   : > { %v2669_v38 = vadd.f32 %v2668_v63, %v769_v42  ;;  %v2547_v4 = vpop.f32.mrb[13].mxu1  ;;  %v2670_v5 = vpop.f32.mrb[17].mxu0  ;;  %v3828_v7 = vcombine.low %v4714_v60, %v4718_v1  ;;  %v5851_v1 = vld [vmem:[%s5687_s26 + $0x18] sm:$0xff] }
 0x29f   : > { %v5820_v6 = vpop.eup %4719  ;;  %v2548_v8 = vadd.f32 %v2547_v4, %v749_v58  ;;  %v2671_v11 = vadd.f32 %v2670_v5, %v773_v59  ;;  %v2549_v14 = vpop.f32.mrb[14].mxu1  ;;  %v3638_v17 = vmul.f32 1.442695, %v2546_v3  ;;  %v3852_v58 = vrot.slane %v3844_v45, %v5788_v21 }
 0x2a0   : > { %v2672_v15 = vpop.f32.mrb[18].mxu0  ;;  %v3861_v16 = vcombine.low %v5818_v61, %v5820_v6  ;;  %v3650_v22 = vmul.f32 1.442695, %v2669_v38  ;;  %v2550_v27 = vpop.f32.mrb[15].mxu1  ;;  %v3842_v23 = vrot.slane %v3828_v7, %v5788_v21  ;;  %v777_v3 = vrot.slane %v5806_v28, %v5725_v9 }
 0x2a1   : > { %v2673_v29 = vpop.f32.mrb[19].mxu0  ;;  %v3640_v32 = vmul.f32 1.442695, %v2548_v8  ;;  %v3652_v33 = vmul.f32 1.442695, %v2671_v11  ;;  %4721 = vpow2.f32 %v3638_v17  ;;  %v801_v38 = vrot.slane %v5851_v1, %v5682_v19 }
 0x2a2   : > { %v3843_v34 = vcombine.low %v3835_v31, %v3842_v23  ;;  %4723 = vpow2.f32 %v3650_v22  ;;  %v805_v37 = vrot.slane %v5851_v1, %v5693_v24  ;;  %v797_v61 = vrot.slane %v5806_v28, %v5770_v2 }
 0x2a3   : > { %4725 = vpow2.f32 %v3640_v32  ;;  %v821_v6 = vrot.slane %v5851_v1, %v5696_v25 }
 0x2a4   : > { %4099 = vst [vmem:[%s5802_s27 + $0x8] sm:$0xff] %v3843_v34  ;;  %4727 = vpow2.f32 %v3652_v33 }
 0x2ab   : > { %v4722_v48 = vpop.eup %4721 }
 0x2ac   : > { %v5838_v39 = vpop.eup %4723  ;;  %v2627_v40 = vpop.f32.mrb[16].mxu1 }
 0x2ad   : > { %v2750_v43 = vpop.f32.mrb[20].mxu0  ;;  %v4726_v44 = vpop.eup %4725  ;;  %v2628_v10 = vadd.f32 %v2627_v40, %v761_v36 }
 0x2ae   : > { %v2751_v46 = vadd.f32 %v2750_v43, %v785_v26  ;;  %v2629_v47 = vpop.f32.mrb[17].mxu1  ;;  %v2752_v49 = vpop.f32.mrb[21].mxu0  ;;  %v3845_v51 = vcombine.low %v4722_v48, %v4726_v44 }
 0x2af   : > { %v5840_v50 = vpop.eup %4727  ;;  %v2630_v52 = vadd.f32 %v2629_v47, %v765_v30  ;;  %v2753_v53 = vadd.f32 %v2752_v49, %v789_v41  ;;  %v2631_v12 = vpop.f32.mrb[18].mxu1  ;;  %v3646_v56 = vmul.f32 1.442695, %v2628_v10  ;;  %v3869_v41 = vrot.slane %v3861_v16, %v5788_v21 }
 0x2b0   : > { %v2754_v54 = vpop.f32.mrb[22].mxu0  ;;  %v3878_v55 = vcombine.low %v5838_v39, %v5840_v50  ;;  %v3658_v57 = vmul.f32 1.442695, %v2751_v46  ;;  %v2632_v35 = vpop.f32.mrb[19].mxu1  ;;  %v3859_v59 = vrot.slane %v3845_v51, %v5788_v21  ;;  %v793_v10 = vrot.slane %v5806_v28, %v5767_v0 }
 0x2b1   : > { %v2755_v42 = vpop.f32.mrb[23].mxu0  ;;  %v3648_v60 = vmul.f32 1.442695, %v2630_v52  ;;  %v3660_v62 = vmul.f32 1.442695, %v2753_v53  ;;  %4729 = vpow2.f32 %v3646_v56  ;;  %v817_v46 = vrot.slane %v5851_v1, %v5685_v20 }
 0x2b2   : > { %v3860_v63 = vcombine.low %v3852_v58, %v3859_v59  ;;  %4731 = vpow2.f32 %v3658_v57  ;;  %v813_v39 = vrot.slane %v5851_v1, %v5731_v13 }
 0x2b3   : > { %4733 = vpow2.f32 %v3648_v60 }
 0x2b4   : > { %4100 = vst [vmem:[%s5802_s27 + $0x10] sm:$0xff] %v3860_v63  ;;  %4735 = vpow2.f32 %v3660_v62 }
 0x2bb   : > { %v4730_v45 = vpop.eup %4729 }
 0x2bc   : > { %v5861_v4 = vpop.eup %4731  ;;  %v2709_v5 = vpop.f32.mrb[20].mxu1 }
 0x2bd   : > { %v2832_v7 = vpop.f32.mrb[24].mxu0  ;;  %v4734_v8 = vpop.eup %4733  ;;  %v2710_v11 = vadd.f32 %v2709_v5, %v777_v3 }
 0x2be   : > { %v2833_v14 = vadd.f32 %v2832_v7, %v801_v38  ;;  %v2711_v15 = vpop.f32.mrb[21].mxu1  ;;  %v2834_v17 = vpop.f32.mrb[25].mxu0  ;;  %v3862_v27 = vcombine.low %v4730_v45, %v4734_v8  ;;  %v5894_v8 = vld [vmem:[%s5687_s26 + $0x20] sm:$0xff] }
 0x2bf   : > { %v5863_v22 = vpop.eup %4735  ;;  %v2712_v29 = vadd.f32 %v2711_v15, %v781_v18  ;;  %v2835_v31 = vadd.f32 %v2834_v17, %v805_v37  ;;  %v2713_v23 = vpop.f32.mrb[22].mxu1  ;;  %v3654_v34 = vmul.f32 1.442695, %v2710_v11  ;;  %v3886_v18 = vrot.slane %v3878_v55, %v5788_v21 }
 0x2c0   : > { %v2836_v32 = vpop.f32.mrb[26].mxu0  ;;  %v3895_v33 = vcombine.low %v5861_v4, %v5863_v22  ;;  %v3666_v36 = vmul.f32 1.442695, %v2833_v14  ;;  %v2714_v26 = vpop.f32.mrb[23].mxu1  ;;  %v3876_v48 = vrot.slane %v3862_v27, %v5788_v21  ;;  %v809_v11 = vrot.slane %v5851_v1, %v5725_v9 }
 0x2c1   : > { %v2837_v30 = vpop.f32.mrb[27].mxu0  ;;  %v3656_v40 = vmul.f32 1.442695, %v2712_v29  ;;  %v3668_v43 = vmul.f32 1.442695, %v2835_v31  ;;  %4737 = vpow2.f32 %v3654_v34  ;;  %v833_v14 = vrot.slane %v5894_v8, %v5682_v19 }
 0x2c2   : > { %v3877_v44 = vcombine.low %v3869_v41, %v3876_v48  ;;  %4739 = vpow2.f32 %v3666_v36  ;;  %v837_v50 = vrot.slane %v5894_v8, %v5693_v24  ;;  %v829_v4 = vrot.slane %v5851_v1, %v5770_v2 }
 0x2c3   : > { %4741 = vpow2.f32 %v3656_v40  ;;  %v853_v22 = vrot.slane %v5894_v8, %v5696_v25 }
 0x2c4   : > { %4101 = vst [vmem:[%s5802_s27 + $0x18] sm:$0xff] %v3877_v44  ;;  %4743 = vpow2.f32 %v3668_v43 }
 0x2cb   : > { %v4738_v16 = vpop.eup %4737 }
 0x2cc   : > { %v5881_v47 = vpop.eup %4739  ;;  %v2791_v49 = vpop.f32.mrb[24].mxu1 }
 0x2cd   : > { %v2914_v51 = vpop.f32.mrb[28].mxu0  ;;  %v4742_v52 = vpop.eup %4741  ;;  %v2792_v53 = vadd.f32 %v2791_v49, %v793_v10 }
 0x2ce   : > { %v2915_v12 = vadd.f32 %v2914_v51, %v817_v46  ;;  %v2793_v54 = vpop.f32.mrb[25].mxu1  ;;  %v2916_v56 = vpop.f32.mrb[29].mxu0  ;;  %v3879_v35 = vcombine.low %v4738_v16, %v4742_v52 }
 0x2cf   : > { %v5883_v57 = vpop.eup %4743  ;;  %v2794_v42 = vadd.f32 %v2793_v54, %v797_v61  ;;  %v2917_v58 = vadd.f32 %v2916_v56, %v821_v6  ;;  %v2795_v28 = vpop.f32.mrb[26].mxu1  ;;  %v3662_v62 = vmul.f32 1.442695, %v2792_v53  ;;  %v3903_v6 = vrot.slane %v3895_v33, %v5788_v21 }
 0x2d0   : > { %v2918_v59 = vpop.f32.mrb[30].mxu0  ;;  %v3912_v60 = vcombine.low %v5881_v47, %v5883_v57  ;;  %v3674_v63 = vmul.f32 1.442695, %v2915_v12  ;;  %v2796_v3 = vpop.f32.mrb[27].mxu1  ;;  %v3893_v37 = vrot.slane %v3879_v35, %v5788_v21  ;;  %v825_v53 = vrot.slane %v5851_v1, %v5767_v0 }
 0x2d1   : > { %v2919_v38 = vpop.f32.mrb[31].mxu0  ;;  %v3664_v45 = vmul.f32 1.442695, %v2794_v42  ;;  %v3676_v5 = vmul.f32 1.442695, %v2917_v58  ;;  %4745 = vpow2.f32 %v3662_v62  ;;  %v849_v12 = vrot.slane %v5894_v8, %v5685_v20 }
 0x2d2   : > { %v3894_v7 = vcombine.low %v3886_v18, %v3893_v37  ;;  %4747 = vpow2.f32 %v3674_v63  ;;  %v845_v47 = vrot.slane %v5894_v8, %v5731_v13 }
 0x2d3   : > { %4749 = vpow2.f32 %v3664_v45 }
 0x2d4   : > { %4102 = vst [vmem:[%s5802_s27 + $0x20] sm:$0xff] %v3894_v7  ;;  %4751 = vpow2.f32 %v3676_v5 }
 0x2db   : > { %v4746_v55 = vpop.eup %4745 }
 0x2dc   : > { %v5904_v15 = vpop.eup %4747  ;;  %v2873_v17 = vpop.f32.mrb[28].mxu1 }
 0x2dd   : > { %v2996_v27 = vpop.f32.mrb[32].mxu0  ;;  %v4750_v29 = vpop.eup %4749  ;;  %v2874_v31 = vadd.f32 %v2873_v17, %v809_v11 }
 0x2de   : > { %v2997_v23 = vadd.f32 %v2996_v27, %v833_v14  ;;  %v2875_v32 = vpop.f32.mrb[29].mxu1  ;;  %v2998_v34 = vpop.f32.mrb[33].mxu0  ;;  %v3896_v26 = vcombine.low %v4746_v55, %v4750_v29  ;;  %v5937_v29 = vld [vmem:[%s5687_s26 + $0x28] sm:$0xff] }
 0x2df   : > { %v5906_v36 = vpop.eup %4751  ;;  %v2876_v30 = vadd.f32 %v2875_v32, %v813_v39  ;;  %v2999_v41 = vadd.f32 %v2998_v34, %v837_v50  ;;  %v2877_v48 = vpop.f32.mrb[30].mxu1  ;;  %v3670_v44 = vmul.f32 1.442695, %v2874_v31  ;;  %v3920_v39 = vrot.slane %v3912_v60, %v5788_v21 }
 0x2e0   : > { %v3000_v40 = vpop.f32.mrb[34].mxu0  ;;  %v3929_v43 = vcombine.low %v5904_v15, %v5906_v36  ;;  %v3682_v10 = vmul.f32 1.442695, %v2997_v23  ;;  %v2878_v46 = vpop.f32.mrb[31].mxu1  ;;  %v3910_v16 = vrot.slane %v3896_v26, %v5788_v21  ;;  %v841_v31 = vrot.slane %v5894_v8, %v5725_v9 }
 0x2e1   : > { %v3001_v61 = vpop.f32.mrb[35].mxu0  ;;  %v3672_v49 = vmul.f32 1.442695, %v2876_v30  ;;  %v3684_v51 = vmul.f32 1.442695, %v2999_v41  ;;  %4753 = vpow2.f32 %v3670_v44  ;;  %v865_v23 = vrot.slane %v5937_v29, %v5682_v19 }
 0x2e2   : > { %v3911_v52 = vcombine.low %v3903_v6, %v3910_v16  ;;  %4755 = vpow2.f32 %v3682_v10  ;;  %v869_v57 = vrot.slane %v5937_v29, %v5693_v24  ;;  %v861_v15 = vrot.slane %v5894_v8, %v5770_v2 }
 0x2e3   : > { %4757 = vpow2.f32 %v3672_v49  ;;  %v885_v36 = vrot.slane %v5937_v29, %v5696_v25 }
 0x2e4   : > { %4103 = vst [vmem:[%s5802_s27 + $0x28] sm:$0xff] %v3911_v52  ;;  %4759 = vpow2.f32 %v3684_v51 }
 0x2eb   : > { %v4754_v33 = vpop.eup %4753 }
 0x2ec   : > { %v5924_v54 = vpop.eup %4755  ;;  %v2955_v56 = vpop.f32.mrb[32].mxu1 }
 0x2ed   : > { %v3078_v35 = vpop.f32.mrb[36].mxu0  ;;  %v4758_v42 = vpop.eup %4757  ;;  %v2956_v58 = vadd.f32 %v2955_v56, %v825_v53 }
 0x2ee   : > { %v3079_v28 = vadd.f32 %v3078_v35, %v849_v12  ;;  %v2957_v59 = vpop.f32.mrb[33].mxu1  ;;  %v3080_v62 = vpop.f32.mrb[37].mxu0  ;;  %v3913_v3 = vcombine.low %v4754_v33, %v4758_v42 }
 0x2ef   : > { %v5926_v63 = vpop.eup %4759  ;;  %v2958_v38 = vadd.f32 %v2957_v59, %v829_v4  ;;  %v3081_v18 = vadd.f32 %v3080_v62, %v853_v22  ;;  %v2959_v1 = vpop.f32.mrb[34].mxu1  ;;  %v3678_v5 = vmul.f32 1.442695, %v2956_v58  ;;  %v3937_v22 = vrot.slane %v3929_v43, %v5788_v21 }
 0x2f0   : > { %v3082_v37 = vpop.f32.mrb[38].mxu0  ;;  %v3946_v45 = vcombine.low %v5924_v54, %v5926_v63  ;;  %v3690_v7 = vmul.f32 1.442695, %v3079_v28  ;;  %v2960_v11 = vpop.f32.mrb[35].mxu1  ;;  %v3927_v50 = vrot.slane %v3913_v3, %v5788_v21  ;;  %v857_v58 = vrot.slane %v5894_v8, %v5767_v0 }
 0x2f1   : > { %v3083_v14 = vpop.f32.mrb[39].mxu0  ;;  %v3680_v55 = vmul.f32 1.442695, %v2958_v38  ;;  %v3692_v17 = vmul.f32 1.442695, %v3081_v18  ;;  %4761 = vpow2.f32 %v3678_v5  ;;  %v881_v28 = vrot.slane %v5937_v29, %v5685_v20 }
 0x2f2   : > { %v3928_v27 = vcombine.low %v3920_v39, %v3927_v50  ;;  %4763 = vpow2.f32 %v3690_v7  ;;  %v877_v54 = vrot.slane %v5937_v29, %v5731_v13 }
 0x2f3   : > { %4765 = vpow2.f32 %v3680_v55 }
 0x2f4   : > { %4104 = vst [vmem:[%s5802_s27 + $0x30] sm:$0xff] %v3928_v27  ;;  %4767 = vpow2.f32 %v3692_v17 }
 0x2fb   : > { %v4762_v60 = vpop.eup %4761 }
 0x2fc   : > { %v5947_v32 = vpop.eup %4763  ;;  %v3037_v34 = vpop.f32.mrb[36].mxu1 }
 0x2fd   : > { %v3160_v26 = vpop.f32.mrb[40].mxu0  ;;  %v4766_v30 = vpop.eup %4765  ;;  %v3038_v41 = vadd.f32 %v3037_v34, %v841_v31 }
 0x2fe   : > { %v3161_v48 = vadd.f32 %v3160_v26, %v865_v23  ;;  %v3039_v40 = vpop.f32.mrb[37].mxu1  ;;  %v3162_v44 = vpop.f32.mrb[41].mxu0  ;;  %v3930_v46 = vcombine.low %v4762_v60, %v4766_v30  ;;  %v5980_v30 = vld [vmem:[%s5687_s26 + $0x30] sm:$0xff] }
 0x2ff   : > { %v5949_v10 = vpop.eup %4767  ;;  %v3040_v61 = vadd.f32 %v3039_v40, %v845_v47  ;;  %v3163_v6 = vadd.f32 %v3162_v44, %v869_v57  ;;  %v3041_v16 = vpop.f32.mrb[38].mxu1  ;;  %v3686_v52 = vmul.f32 1.442695, %v3038_v41  ;;  %v3954_v47 = vrot.slane %v3946_v45, %v5788_v21 }
 0x300   : > { %v3164_v49 = vpop.f32.mrb[42].mxu0  ;;  %v3963_v51 = vcombine.low %v5947_v32, %v5949_v10  ;;  %v3698_v53 = vmul.f32 1.442695, %v3161_v48  ;;  %v3042_v12 = vpop.f32.mrb[39].mxu1  ;;  %v3944_v33 = vrot.slane %v3930_v46, %v5788_v21  ;;  %v873_v41 = vrot.slane %v5937_v29, %v5725_v9 }
 0x301   : > { %v3165_v4 = vpop.f32.mrb[43].mxu0  ;;  %v3688_v56 = vmul.f32 1.442695, %v3040_v61  ;;  %v3700_v35 = vmul.f32 1.442695, %v3163_v6  ;;  %4769 = vpow2.f32 %v3686_v52  ;;  %v897_v48 = vrot.slane %v5980_v30, %v5682_v19 }
 0x302   : > { %v3945_v42 = vcombine.low %v3937_v22, %v3944_v33  ;;  %4771 = vpow2.f32 %v3698_v53  ;;  %v901_v63 = vrot.slane %v5980_v30, %v5693_v24  ;;  %v893_v32 = vrot.slane %v5937_v29, %v5770_v2 }
 0x303   : > { %4773 = vpow2.f32 %v3688_v56  ;;  %v917_v10 = vrot.slane %v5980_v30, %v5696_v25 }
 0x304   : > { %4105 = vst [vmem:[%s5802_s27 + $0x38] sm:$0xff] %v3945_v42  ;;  %4775 = vpow2.f32 %v3700_v35 }
 0x30b   : > { %v4770_v43 = vpop.eup %4769 }
 0x30c   : > { %v5967_v59 = vpop.eup %4771  ;;  %v3119_v62 = vpop.f32.mrb[40].mxu1 }
 0x30d   : > { %v3242_v3 = vpop.f32.mrb[44].mxu0  ;;  %v4774_v38 = vpop.eup %4773  ;;  %v3120_v18 = vadd.f32 %v3119_v62, %v857_v58 }
 0x30e   : > { %v3243_v1 = vadd.f32 %v3242_v3, %v881_v28  ;;  %v3121_v37 = vpop.f32.mrb[41].mxu1  ;;  %v3244_v5 = vpop.f32.mrb[45].mxu0  ;;  %v3947_v11 = vcombine.low %v4770_v43, %v4774_v38 }
 0x30f   : > { %v5969_v7 = vpop.eup %4775  ;;  %v3122_v14 = vadd.f32 %v3121_v37, %v861_v15  ;;  %v3245_v39 = vadd.f32 %v3244_v5, %v885_v36  ;;  %v3123_v8 = vpop.f32.mrb[42].mxu1  ;;  %v3694_v17 = vmul.f32 1.442695, %v3120_v18  ;;  %v3971_v36 = vrot.slane %v3963_v51, %v5788_v21 }
 0x310   : > { %v3246_v50 = vpop.f32.mrb[46].mxu0  ;;  %v3980_v55 = vcombine.low %v5967_v59, %v5969_v7  ;;  %v3706_v27 = vmul.f32 1.442695, %v3243_v1  ;;  %v3124_v31 = vpop.f32.mrb[43].mxu1  ;;  %v3961_v57 = vrot.slane %v3947_v11, %v5788_v21  ;;  %v889_v18 = vrot.slane %v5937_v29, %v5767_v0 }
 0x311   : > { %v3247_v23 = vpop.f32.mrb[47].mxu0  ;;  %v3696_v60 = vmul.f32 1.442695, %v3122_v14  ;;  %v3708_v34 = vmul.f32 1.442695, %v3245_v39  ;;  %4777 = vpow2.f32 %v3694_v17  ;;  %v913_v1 = vrot.slane %v5980_v30, %v5685_v20 }
 0x312   : > { %v3962_v26 = vcombine.low %v3954_v47, %v3961_v57  ;;  %4779 = vpow2.f32 %v3706_v27  ;;  %v909_v59 = vrot.slane %v5980_v30, %v5731_v13 }
 0x313   : > { %4781 = vpow2.f32 %v3696_v60 }
 0x314   : > { %4106 = vst [vmem:[%s5802_s27 + $0x40] sm:$0xff] %v3962_v26  ;;  %4783 = vpow2.f32 %v3708_v34 }
 0x31b   : > { %v4778_v45 = vpop.eup %4777 }
 0x31c   : > { %v5990_v40 = vpop.eup %4779  ;;  %v3201_v44 = vpop.f32.mrb[44].mxu1 }
 0x31d   : > { %v3324_v46 = vpop.f32.mrb[48].mxu0  ;;  %v4782_v61 = vpop.eup %4781  ;;  %v3202_v6 = vadd.f32 %v3201_v44, %v873_v41 }
 0x31e   : > { %v3325_v16 = vadd.f32 %v3324_v46, %v897_v48  ;;  %v3203_v49 = vpop.f32.mrb[45].mxu1  ;;  %v3326_v52 = vpop.f32.mrb[49].mxu0  ;;  %v3964_v12 = vcombine.low %v4778_v45, %v4782_v61  ;;  %v6023_v61 = vld [vmem:[%s5687_s26 + $0x38] sm:$0xff] }
 0x31f   : > { %v5992_v53 = vpop.eup %4783  ;;  %v3204_v4 = vadd.f32 %v3203_v49, %v877_v54  ;;  %v3327_v22 = vadd.f32 %v3326_v52, %v901_v63  ;;  %v3205_v33 = vpop.f32.mrb[46].mxu1  ;;  %v3702_v42 = vmul.f32 1.442695, %v3202_v6  ;;  %v3988_v54 = vrot.slane %v3980_v55, %v5788_v21 }
 0x320   : > { %v3328_v56 = vpop.f32.mrb[50].mxu0  ;;  %v3997_v35 = vcombine.low %v5990_v40, %v5992_v53  ;;  %v3714_v58 = vmul.f32 1.442695, %v3325_v16  ;;  %v3206_v28 = vpop.f32.mrb[47].mxu1  ;;  %v3978_v43 = vrot.slane %v3964_v12, %v5788_v21  ;;  %v905_v6 = vrot.slane %v5980_v30, %v5725_v9 }
 0x321   : > { %v3329_v15 = vpop.f32.mrb[51].mxu0  ;;  %v3704_v62 = vmul.f32 1.442695, %v3204_v4  ;;  %v3716_v3 = vmul.f32 1.442695, %v3327_v22  ;;  %4785 = vpow2.f32 %v3702_v42  ;;  %v929_v16 = vrot.slane %v6023_v61, %v5682_v19 }
 0x322   : > { %v3979_v38 = vcombine.low %v3971_v36, %v3978_v43  ;;  %4787 = vpow2.f32 %v3714_v58  ;;  %v933_v7 = vrot.slane %v6023_v61, %v5693_v24  ;;  %v925_v40 = vrot.slane %v5980_v30, %v5770_v2 }
 0x323   : > { %4789 = vpow2.f32 %v3704_v62  ;;  %v949_v53 = vrot.slane %v6023_v61, %v5696_v25 }
 0x324   : > { %4107 = vst [vmem:[%s5802_s27 + $0x48] sm:$0xff] %v3979_v38  ;;  %4791 = vpow2.f32 %v3716_v3 }
 0x32b   : > { %v4786_v51 = vpop.eup %4785 }
 0x32c   : > { %v6010_v37 = vpop.eup %4787  ;;  %v3283_v5 = vpop.f32.mrb[48].mxu1 }
 0x32d   : > { %v3406_v11 = vpop.f32.mrb[52].mxu0  ;;  %v4790_v14 = vpop.eup %4789  ;;  %v3284_v39 = vadd.f32 %v3283_v5, %v889_v18 }
 0x32e   : > { %v3407_v8 = vadd.f32 %v3406_v11, %v913_v1  ;;  %v3285_v50 = vpop.f32.mrb[49].mxu1  ;;  %v3408_v17 = vpop.f32.mrb[53].mxu0  ;;  %v3981_v31 = vcombine.low %v4786_v51, %v4790_v14  ;;  %v4005_v1 = vrot.slane %v3997_v35, %v5788_v21  ;;  %v921_v11 = vrot.slane %v5980_v30, %v5767_v0 }
 0x32f   : > { %v6012_v27 = vpop.eup %4791  ;;  %v3286_v23 = vadd.f32 %v3285_v50, %v893_v32  ;;  %v3409_v47 = vadd.f32 %v3408_v17, %v917_v10  ;;  %v3287_v29 = vpop.f32.mrb[50].mxu1  ;;  %v3710_v34 = vmul.f32 1.442695, %v3284_v39  ;;  %v945_v14 = vrot.slane %v6023_v61, %v5685_v20 }
 0x330   : > { %v3410_v57 = vpop.f32.mrb[54].mxu0  ;;  %v4014_v60 = vcombine.low %v6010_v37, %v6012_v27  ;;  %v3722_v26 = vmul.f32 1.442695, %v3407_v8  ;;  %v3288_v41 = vpop.f32.mrb[51].mxu1  ;;  %v3995_v63 = vrot.slane %v3981_v31, %v5788_v21 }
 0x331   : > { %v3411_v48 = vpop.f32.mrb[55].mxu0  ;;  %v3712_v45 = vmul.f32 1.442695, %v3286_v23  ;;  %v3724_v44 = vmul.f32 1.442695, %v3409_v47  ;;  %4793 = vpow2.f32 %v3710_v34 }
 0x332   : > { %v3996_v46 = vcombine.low %v3988_v54, %v3995_v63  ;;  %4795 = vpow2.f32 %v3722_v26 }
 0x333   : > { %4797 = vpow2.f32 %v3712_v45 }
 0x334   : > { %4108 = vst [vmem:[%s5802_s27 + $0x50] sm:$0xff] %v3996_v46  ;;  %4799 = vpow2.f32 %v3724_v44  ;;  %v4022_v44 = vrot.slane %v4014_v60, %v5788_v21 }
 0x33b   : > { %v4794_v55 = vpop.eup %4793 }
 0x33c   : > { %v6033_v49 = vpop.eup %4795  ;;  %v3365_v52 = vpop.f32.mrb[52].mxu1 }
 0x33d   : > { %v3488_v12 = vpop.f32.mrb[56].mxu0  ;;  %v4798_v4 = vpop.eup %4797  ;;  %v3366_v22 = vadd.f32 %v3365_v52, %v905_v6 }
 0x33e   : > { %v3489_v33 = vadd.f32 %v3488_v12, %v929_v16  ;;  %v3367_v56 = vpop.f32.mrb[53].mxu1  ;;  %v3490_v42 = vpop.f32.mrb[57].mxu0  ;;  %v3998_v28 = vcombine.low %v4794_v55, %v4798_v4  ;;  %v941_v55 = vrot.slane %v6023_v61, %v5731_v13 }
 0x33f   : > { %v6035_v58 = vpop.eup %4799  ;;  %v3368_v19 = vadd.f32 %v3367_v56, %v909_v59  ;;  %v3491_v15 = vadd.f32 %v3490_v42, %v933_v7  ;;  %v3369_v36 = vpop.f32.mrb[54].mxu1  ;;  %v3718_v62 = vmul.f32 1.442695, %v3366_v22  ;;  %v937_v7 = vrot.slane %v6023_v61, %v5725_v9 }
 0x340   : > { %v3492_v43 = vpop.f32.mrb[58].mxu0  ;;  %v4031_v24 = vcombine.low %v6033_v49, %v6035_v58  ;;  %v3730_v3 = vmul.f32 1.442695, %v3489_v33  ;;  %v3370_v38 = vpop.f32.mrb[55].mxu1  ;;  %v4012_v32 = vrot.slane %v3998_v28, %v5788_v21 }
 0x341   : > { %v3493_v18 = vpop.f32.mrb[59].mxu0  ;;  %v3720_v10 = vmul.f32 1.442695, %v3368_v19  ;;  %v3732_v51 = vmul.f32 1.442695, %v3491_v15  ;;  %4801 = vpow2.f32 %v3718_v62  ;;  %v953_v62 = vrot.slane %v6023_v61, %v5767_v0 }
 0x342   : > { %v4013_v5 = vcombine.low %v4005_v1, %v4012_v32  ;;  %4803 = vpow2.f32 %v3730_v3  ;;  %v4039_v9 = vrot.slane %v4031_v24, %v5788_v21  ;;  %v957_v3 = vrot.slane %v6023_v61, %v5770_v2 }
 0x343   : > { %4805 = vpow2.f32 %v3720_v10 }
 0x344   : > { %4109 = vst [vmem:[%s5802_s27 + $0x58] sm:$0xff] %v4013_v5  ;;  %4807 = vpow2.f32 %v3732_v51 }
 0x34b   : > { %v4802_v35 = vpop.eup %4801 }
 0x34c   : > { %v4804_v39 = vpop.eup %4803  ;;  %v3447_v8 = vpop.f32.mrb[56].mxu1 }
 0x34d   : > { %v3570_v50 = vpop.f32.mrb[60].mxu0  ;;  %v4806_v17 = vpop.eup %4805  ;;  %v3448_v31 = vadd.f32 %v3447_v8, %v921_v11 }
 0x34e   : > { %v3571_v23 = vadd.f32 %v3570_v50, %v945_v14  ;;  %v3449_v47 = vpop.f32.mrb[57].mxu1  ;;  %v3572_v29 = vpop.f32.mrb[61].mxu0  ;;  %v4015_v34 = vcombine.low %v4802_v35, %v4806_v17 }
 0x34f   : > { %v4808_v57 = vpop.eup %4807  ;;  %v3450_v26 = vadd.f32 %v3449_v47, %v925_v40  ;;  %v3573_v41 = vadd.f32 %v3572_v29, %v949_v53  ;;  %v3451_v20 = vpop.f32.mrb[58].mxu1  ;;  %v3726_v54 = vmul.f32 1.442695, %v3448_v31 }
 0x350   : > { %v3574_v48 = vpop.f32.mrb[62].mxu0  ;;  %v4048_v30 = vcombine.low %v4804_v39, %v4808_v57  ;;  %v3738_v63 = vmul.f32 1.442695, %v3571_v23  ;;  %v3452_v25 = vpop.f32.mrb[59].mxu1  ;;  %v4029_v46 = vrot.slane %v4015_v34, %v5788_v21 }
 0x351   : > { %v3575_v45 = vpop.f32.mrb[63].mxu0  ;;  %v3728_v6 = vmul.f32 1.442695, %v3450_v26  ;;  %v3740_v16 = vmul.f32 1.442695, %v3573_v41  ;;  %4809 = vpow2.f32 %v3726_v54 }
 0x352   : > { %v4030_v59 = vcombine.low %v4022_v44, %v4029_v46  ;;  %4811 = vpow2.f32 %v3738_v63  ;;  %v4056_v51 = vrot.slane %v4048_v30, %v5788_v21 }
 0x353   : > { %4813 = vpow2.f32 %v3728_v6 }
 0x354   : > { %4110 = vst [vmem:[%s5802_s27 + $0x60] sm:$0xff] %v4030_v59  ;;  %4815 = vpow2.f32 %v3740_v16 }
 0x35b   : > { %v4810_v52 = vpop.eup %4809 }
 0x35c   : > { %v4812_v12 = vpop.eup %4811  ;;  %v3529_v37 = vpop.f32.mrb[60].mxu1 }
 0x35d   : > { %v4814_v27 = vpop.eup %4813  ;;  %v3530_v60 = vadd.f32 %v3529_v37, %v937_v7  ;;  %v3531_v4 = vpop.f32.mrb[61].mxu1 }
 0x35e   : > { %v4816_v22 = vpop.eup %4815  ;;  %v4032_v33 = vcombine.low %v4810_v52, %v4814_v27  ;;  %v3532_v56 = vadd.f32 %v3531_v4, %v941_v55  ;;  %v3533_v42 = vpop.f32.mrb[62].mxu1 }
 0x35f   : > { %v4065_v28 = vcombine.low %v4812_v12, %v4816_v22  ;;  %v3734_v19 = vmul.f32 1.442695, %v3530_v60  ;;  %v3534_v15 = vpop.f32.mrb[63].mxu1 }
 0x360   : > { %v4046_v13 = vrot.slane %v4032_v33, %v5788_v21  ;;  %v3736_v36 = vmul.f32 1.442695, %v3532_v56 }
 0x361   : > { %4817 = vpow2.f32 %v3734_v19  ;;  %v4073_v35 = vrot.slane %v4065_v28, %v5788_v21 }
 0x362   : > { %v4047_v43 = vcombine.low %v4039_v9, %v4046_v13  ;;  %4819 = vpow2.f32 %v3736_v36 }
 0x364   : > { %4111 = vst [vmem:[%s5802_s27 + $0x68] sm:$0xff] %v4047_v43 }
 0x36b   : > { %v4818_v38 = vpop.eup %4817 }
 0x36c   : > { %v4820_v18 = vpop.eup %4819  ;;  %v3611_v1 = vpop.f32.mrb[64].mxu1 }
 0x36d   : > { %v4049_v32 = vcombine.low %v4818_v38, %v4820_v18  ;;  %v3612_v49 = vadd.f32 %v3611_v1, %v953_v62  ;;  %v3613_v58 = vpop.f32.mrb[65].mxu1 }
 0x36e   : > { %v3614_v24 = vadd.f32 %v3613_v58, %v957_v3  ;;  %v3615_v10 = vpop.f32.mrb[66].mxu1 }
 0x36f   : > { %v4063_v5 = vrot.slane %v4049_v32, %v5788_v21  ;;  %v3742_v11 = vmul.f32 1.442695, %v3612_v49  ;;  %v3616_v0 = vpop.f32.mrb[67].mxu1 }
 0x370   : > { %v3744_v14 = vmul.f32 1.442695, %v3614_v24 }
 0x371   : > { %v4064_v2 = vcombine.low %v4056_v51, %v4063_v5  ;;  %4821 = vpow2.f32 %v3742_v11 }
 0x372   : > { %4823 = vpow2.f32 %v3744_v14 }
 0x373   : > { %4112 = vst [vmem:[%s5802_s27 + $0x70] sm:$0xff] %v4064_v2 }
 0x37b   : > { %v4822_v61 = vpop.eup %4821 }
 0x37c   : > { %v4824_v40 = vpop.eup %4823 }
 0x37d   : > { %v4066_v53 = vcombine.low %v4822_v61, %v4824_v40 }
 0x37f   : > { %v4080_v39 = vrot.slane %v4066_v53, %v5788_v21 }
 0x381   : > { %v4081_v8 = vcombine.low %v4073_v35, %v4080_v39 }
 0x383   : > { %4113 = vst [vmem:[%s5802_s27 + $0x78] sm:$0xff] %v4081_v8 }
 0x384   : > { %4954 = shalt.err (!%p4951_p7)
}
 0x385   : > { %s4955_s8 = scalar_lea.hbm %s6083_s28, 2048  ;;  %s4959_s14 = scalar_lea.hbm %s6133_s5, 4096 }
 0x386   : > { %p4956_p4 = scmp.ne.s32.totalorder %s6083_s28, %s4955_s8  ;;  %p4960_p13 = scmp.lt.u32.totalorder %s6083_s28, %s6133_s5 }
 0x387   : > { %p4961_p3 = scmp.lt.u32.totalorder %s4959_s14, %s4955_s8  ;;  %p4963_p8 = scmp.lt.u32.totalorder %s4955_s8, %s6083_s28 }
 0x388   : > { %p4957_p0 = pnand %p4956_p4, %p6174_p10 }
 0x389   : > { %p4962_p12 = por %p4961_p3, %p4960_p13 }
 0x38a   : > { %p4958_p6 = pneg %p4957_p0 }
 0x38b   : > { %p4964_p1 = por %p4963_p8, %p4962_p12 }
 0x38d   : > { %p4965_p11 = pnand %p4964_p1, %p4958_p6 }
 0x38f   : > { %4968 = shalt.err (!%p4965_p11)
}
 0x390   : > { %4632 = dma.vmem_to_hbm [thread:$0]  (%p6174_p10), %s6085_s11, 2048, %s6083_s28, %s4115_s0  }
 0x391 PF: > { %s6175_s17 = sld [smem:[#allocation16_spill]]  ;;  %s4141_s10 = sand.u32 1, %s5003_s18  }
 0x392   : > { %p6177_p2 = scmp.ge.s32.totalorder %s5015_s21, 2  ;;  %s4142_s15 = scalar_lea.sflag [#allocation4], %s4141_s10 }
 0x397   : > { %p6176_p9 = scmp.ne.s32.totalorder %s6175_s17, 0 }
 0x399   : > { %p4649_p5 = pnand %p6177_p2, %p6176_p9 }
 0x39b   : > { %4998 = dma.done.wait (!%p4649_p5), %s4142_s15, 2048  }
 0x39c   : > { %5000 = vsyncadd (!%p4649_p5), %s4142_s15, 4294965248  ;;  %s6178_s21 = sld [smem:[#allocation14_spill]]  ;;  %s6179_s26 = sld [smem:[#allocation15_spill]] }
 0x39d   : > { %s6180_s18 = smov %s5007_s19  ;;  %s6181_s19 = smov %s5011_s20 }
 0x3a2   : > { %p17_p7 = scmp.ge.s32.totalorder %s6178_s21, 4   ;;  %s6182_s20 = smov %s6179_s26 }
 0x3a4   :  { %19 = sbr.rel (!%p17_p7) target bundleno = 8 (0x8), region = 103 }
 0x3ab   :  { %4147 = vsyncpa [#allocation3], 1 }
 0x3ac   :  { %4149 = vsyncpa [#allocation3 + $0x1], 1 }
 0x3ad   :  { %4150 = vsyncpa [#allocation6], 1 }
 0x3ae   :  { %4151 = vsyncpa [#allocation4], 1 }
 0x3af   :  { %4153 = vsyncpa [#allocation4 + $0x1], 1 }

</bundles_post_ra>
